<compile_context>
chip_gen: v7x
topology: tpu7x:2x2x1
jax: 0.10.0
libtpu: 0.0.40
codegen_flags: <defaults>
</compile_context>

<pallas_src>
import functools

import jax
import jax.numpy as jnp
from jax.experimental import pallas as pl
from jax.experimental.pallas import tpu as pltpu

HIDDEN = 50        # real hidden width of the PyTorch module
HIDDEN_PAD = 128   # hidden width padded to the lane width (matmuls lane-dense)
SUBLANE = 8


def _round_up(n, m):
    return ((n + m - 1) // m) * m


def _choose_tile(batch, tile_b, min_grid_steps):
    """Row tile: multiple of 8, <= tile_b, and small enough to give the grid
    at least `min_grid_steps` steps when the batch allows (megacore on v7x)."""
    tb = _round_up(pl.cdiv(batch, min_grid_steps), SUBLANE)
    tb = min(tb, tile_b, _round_up(batch, SUBLANE))
    return max(SUBLANE, tb)


def _mlp_kernel(x_ref,
                w1_ref, b1_ref,
                w2_ref, b2_ref,
                w3_ref, b3_ref,
                w4_ref, b4_ref,
                w5_ref, b5_ref,
                out_ref, *, compute_dtype, precision):
    """One batch tile: 5 matmuls + 4 ReLUs, all operands resident in VMEM."""

    def layer(h, w_ref, b_ref, relu):
        # MXU matmul with f32 accumulation; bias add + ReLU in f32 on the VPU.
        acc = jnp.dot(h, w_ref[...], preferred_element_type=jnp.float32,
                      precision=precision)
        acc = acc + b_ref[...].astype(jnp.float32)
        if relu:
            acc = jnp.maximum(acc, 0.0)
        return acc

    h = x_ref[...].astype(compute_dtype)
    h = layer(h, w1_ref, b1_ref, True).astype(compute_dtype)
    h = layer(h, w2_ref, b2_ref, True).astype(compute_dtype)
    h = layer(h, w3_ref, b3_ref, True).astype(compute_dtype)
    h = layer(h, w4_ref, b4_ref, True).astype(compute_dtype)
    y = layer(h, w5_ref, b5_ref, False)          # (tb, out_dim), f32
    out_ref[...] = y.astype(out_ref.dtype)       # unpadded, narrow store


def prepare_params(params, compute_dtype=jnp.bfloat16):
    """Zero-pad hidden dims to 128 lanes; cast weights to the compute dtype.

    `params` is a list of (W, b) with W (fan_in, fan_out) and b (1, fan_out)
    in float32.  Zero padding is exact: padded weight rows/cols and bias lanes
    are zero, so padded activation lanes stay zero through every ReLU layer.
    The first layer's fan_in and the last layer's fan_out are left unpadded
    (lane-dense stores are not needed there; the output store stays narrow).
    """
    n = len(params)
    padded = []
    for idx, (w, b) in enumerate(params):
        fan_in, fan_out = w.shape
        in_pad = fan_in if idx == 0 else HIDDEN_PAD
        out_pad = fan_out if idx == n - 1 else HIDDEN_PAD
        w_p = jnp.zeros((in_pad, out_pad), jnp.float32).at[:fan_in, :fan_out].set(w)
        b_p = jnp.zeros((1, out_pad), jnp.float32).at[:, :fan_out].set(b)
        padded.append((w_p.astype(compute_dtype), b_p))   # biases stay f32
    return padded


def network_forward(x, padded_params, out_dim, *,
                    compute_dtype=jnp.bfloat16, tile_b=2048, min_grid_steps=4):
    """x: (B, input_dim) float32; padded_params from prepare_params()."""
    B, in_dim = x.shape
    tb = _choose_tile(B, tile_b, min_grid_steps)
    grid = (pl.cdiv(B, tb),)   # no wrapper pad; Pallas masks the ragged last block

    flat_args = [x]
    in_specs = [pl.BlockSpec((tb, in_dim), lambda i: (i, 0))]
    for w, b in padded_params:
        flat_args += [w, b]
        # Constant index maps: weights/biases stay resident in VMEM across all
        # batch-grid steps (no per-step weight DMA).
        in_specs.append(pl.BlockSpec(w.shape, lambda i: (0, 0)))
        in_specs.append(pl.BlockSpec(b.shape, lambda i: (0, 0)))
    # Unpadded, narrow output store: last dim equals the full array dim.
    out_spec = pl.BlockSpec((tb, out_dim), lambda i: (i, 0))

    precision = (jax.lax.Precision.HIGHEST
                 if compute_dtype == jnp.float32 else None)
    kernel = functools.partial(_mlp_kernel,
                               compute_dtype=compute_dtype,
                               precision=precision)
    return pl.pallas_call(
        kernel,
        grid=grid,
        in_specs=in_specs,
        out_specs=out_spec,
        out_shape=jax.ShapeDtypeStruct((B, out_dim), jnp.float32),
        compiler_params=pltpu.CompilerParams(
            dimension_semantics=("parallel",)),   # both TCs on v7x
    )(*flat_args)


def init_params(key, input_dim, output_dim):
    """Deterministic init mirroring nn.Linear shapes (uniform +-1/sqrt(fan_in))."""
    dims = [input_dim, HIDDEN, HIDDEN, HIDDEN, HIDDEN, output_dim]
    params = []
    for i in range(5):
        fan_in, fan_out = dims[i], dims[i + 1]
        key, kw, kb = jax.random.split(key, 3)
        bound = 1.0 / jnp.sqrt(fan_in)
        w = jax.random.uniform(kw, (fan_in, fan_out), jnp.float32, -bound, bound)
        b = jax.random.uniform(kb, (1, fan_out), jnp.float32, -bound, bound)
        params.append((w, b))
    return params


def reference_forward(x, params):
    h = x
    for i, (w, b) in enumerate(params):
        h = h @ w + b
        if i < len(params) - 1:
            h = jnp.maximum(h, 0.0)
    return h


if __name__ == "__main__":
    key = jax.random.PRNGKey(0)
    input_dim, output_dim = 4, 3
    params = init_params(key, input_dim, output_dim)

    # Exact-semantics path: small batch, f32 MXU operands at HIGHEST precision.
    batch = 8
    key, kx = jax.random.split(key)
    x = jax.random.normal(kx, (batch, input_dim), jnp.float32)
    ref = reference_forward(x, params)

    p_f32 = prepare_params(params, compute_dtype=jnp.float32)
    out_f32 = jax.block_until_ready(
        network_forward(x, p_f32, output_dim, compute_dtype=jnp.float32))
    assert out_f32.shape == (batch, output_dim)
    assert jnp.allclose(out_f32, ref, atol=1e-5, rtol=1e-5), "f32 mismatch vs reference"

    # Larger ragged batch: exercises multi-step grid + masked last block.
    batch2 = 300
    key, kx2 = jax.random.split(key)
    x2 = jax.random.normal(kx2, (batch2, input_dim), jnp.float32)
    ref2 = reference_forward(x2, params)
    out2 = jax.block_until_ready(
        network_forward(x2, p_f32, output_dim, compute_dtype=jnp.float32))
    assert out2.shape == (batch2, output_dim)
    assert jnp.allclose(out2, ref2, atol=1e-5, rtol=1e-5), "ragged f32 mismatch"

    # Fast path for v6e/v7x: bf16 MXU operands, f32 accumulation (loose
    # tolerance; note x itself is cast to bf16, so input quantization error
    # is included).
    p_bf16 = prepare_params(params, compute_dtype=jnp.bfloat16)
    out_bf16 = jax.block_until_ready(
        network_forward(x2, p_bf16, output_dim, compute_dtype=jnp.bfloat16))
    assert out_bf16.shape == (batch2, output_dim)
    assert jnp.allclose(out_bf16, ref2, atol=1e-1, rtol=1e-1), "bf16 mismatch vs reference"

    print("KERNEL_OK")
</pallas_src>

<mosaic_0001>
module attributes {stable_mosaic.version = 11 : i64} {
  func.func @_mlp_kernel(%arg0: i32, %arg1: memref<8x4xf32, #tpu.memory_space<vmem>>, %arg2: memref<4x128xf32, #tpu.memory_space<vmem>>, %arg3: memref<1x128xf32, #tpu.memory_space<vmem>>, %arg4: memref<128x128xf32, #tpu.memory_space<vmem>>, %arg5: memref<1x128xf32, #tpu.memory_space<vmem>>, %arg6: memref<128x128xf32, #tpu.memory_space<vmem>>, %arg7: memref<1x128xf32, #tpu.memory_space<vmem>>, %arg8: memref<128x128xf32, #tpu.memory_space<vmem>>, %arg9: memref<1x128xf32, #tpu.memory_space<vmem>>, %arg10: memref<128x3xf32, #tpu.memory_space<vmem>>, %arg11: memref<1x3xf32, #tpu.memory_space<vmem>>, %arg12: memref<8x3xf32, #tpu.memory_space<vmem>>) attributes {dimension_semantics = [#tpu.dimension_semantics<parallel>], iteration_bounds = array<i64: 1>, scalar_prefetch = 0 : i64, scratch_operands = 0 : i64, tpu.core_type = #tpu.core_type<tc>, window_params = [{transform_indices = @transform_0, window_bounds = array<i64: 8, 4>}, {pipeline_mode = #tpu.pipeline_mode<synchronous>, transform_indices = @transform_1, window_bounds = array<i64: 4, 128>}, {pipeline_mode = #tpu.pipeline_mode<synchronous>, transform_indices = @transform_2, window_bounds = array<i64: 1, 128>}, {pipeline_mode = #tpu.pipeline_mode<synchronous>, transform_indices = @transform_3, window_bounds = array<i64: 128, 128>}, {pipeline_mode = #tpu.pipeline_mode<synchronous>, transform_indices = @transform_4, window_bounds = array<i64: 1, 128>}, {pipeline_mode = #tpu.pipeline_mode<synchronous>, transform_indices = @transform_5, window_bounds = array<i64: 128, 128>}, {pipeline_mode = #tpu.pipeline_mode<synchronous>, transform_indices = @transform_6, window_bounds = array<i64: 1, 128>}, {pipeline_mode = #tpu.pipeline_mode<synchronous>, transform_indices = @transform_7, window_bounds = array<i64: 128, 128>}, {pipeline_mode = #tpu.pipeline_mode<synchronous>, transform_indices = @transform_8, window_bounds = array<i64: 1, 128>}, {pipeline_mode = #tpu.pipeline_mode<synchronous>, transform_indices = @transform_9, window_bounds = array<i64: 128, 3>}, {pipeline_mode = #tpu.pipeline_mode<synchronous>, transform_indices = @transform_10, window_bounds = array<i64: 1, 3>}, {transform_indices = @transform_11, window_bounds = array<i64: 8, 3>}]} {
    %c0 = arith.constant 0 : index
    %c0_0 = arith.constant 0 : index
    %0 = vector.load %arg1[%c0, %c0_0] : memref<8x4xf32, #tpu.memory_space<vmem>>, vector<8x4xf32>
    %c0_1 = arith.constant 0 : index
    %c0_2 = arith.constant 0 : index
    %1 = vector.load %arg2[%c0_1, %c0_2] : memref<4x128xf32, #tpu.memory_space<vmem>>, vector<4x128xf32>
    %cst = arith.constant dense<0.000000e+00> : vector<8x128xf32>
    %2 = tpu.matmul %0, %1, %cst {dimension_numbers = #tpu.dot_dimension_numbers<[1], [0], [0], [1], [0, 0, 1, 1], [], []>, precision = #tpu.contract_precision<fp32>} : vector<8x4xf32>, vector<4x128xf32>, vector<8x128xf32> -> vector<8x128xf32>
    %c0_3 = arith.constant 0 : index
    %c0_4 = arith.constant 0 : index
    %3 = vector.load %arg3[%c0_3, %c0_4] : memref<1x128xf32, #tpu.memory_space<vmem>>, vector<1x128xf32>
    %4 = vector.broadcast %3 : vector<1x128xf32> to vector<8x128xf32>
    %5 = arith.addf %2, %4 : vector<8x128xf32>
    %cst_5 = arith.constant 0.000000e+00 : f32
    %6 = vector.broadcast %cst_5 : f32 to vector<8x128xf32>
    %7 = arith.maximumf %5, %6 : vector<8x128xf32>
    %c0_6 = arith.constant 0 : index
    %c0_7 = arith.constant 0 : index
    %8 = vector.load %arg4[%c0_6, %c0_7] : memref<128x128xf32, #tpu.memory_space<vmem>>, vector<128x128xf32>
    %cst_8 = arith.constant dense<0.000000e+00> : vector<8x128xf32>
    %9 = tpu.matmul %7, %8, %cst_8 {dimension_numbers = #tpu.dot_dimension_numbers<[1], [0], [0], [1], [0, 0, 1, 1], [], []>, precision = #tpu.contract_precision<fp32>} : vector<8x128xf32>, vector<128x128xf32>, vector<8x128xf32> -> vector<8x128xf32>
    %c0_9 = arith.constant 0 : index
    %c0_10 = arith.constant 0 : index
    %10 = vector.load %arg5[%c0_9, %c0_10] : memref<1x128xf32, #tpu.memory_space<vmem>>, vector<1x128xf32>
    %11 = vector.broadcast %10 : vector<1x128xf32> to vector<8x128xf32>
    %12 = arith.addf %9, %11 : vector<8x128xf32>
    %cst_11 = arith.constant 0.000000e+00 : f32
    %13 = vector.broadcast %cst_11 : f32 to vector<8x128xf32>
    %14 = arith.maximumf %12, %13 : vector<8x128xf32>
    %c0_12 = arith.constant 0 : index
    %c0_13 = arith.constant 0 : index
    %15 = vector.load %arg6[%c0_12, %c0_13] : memref<128x128xf32, #tpu.memory_space<vmem>>, vector<128x128xf32>
    %cst_14 = arith.constant dense<0.000000e+00> : vector<8x128xf32>
    %16 = tpu.matmul %14, %15, %cst_14 {dimension_numbers = #tpu.dot_dimension_numbers<[1], [0], [0], [1], [0, 0, 1, 1], [], []>, precision = #tpu.contract_precision<fp32>} : vector<8x128xf32>, vector<128x128xf32>, vector<8x128xf32> -> vector<8x128xf32>
    %c0_15 = arith.constant 0 : index
    %c0_16 = arith.constant 0 : index
    %17 = vector.load %arg7[%c0_15, %c0_16] : memref<1x128xf32, #tpu.memory_space<vmem>>, vector<1x128xf32>
    %18 = vector.broadcast %17 : vector<1x128xf32> to vector<8x128xf32>
    %19 = arith.addf %16, %18 : vector<8x128xf32>
    %cst_17 = arith.constant 0.000000e+00 : f32
    %20 = vector.broadcast %cst_17 : f32 to vector<8x128xf32>
    %21 = arith.maximumf %19, %20 : vector<8x128xf32>
    %c0_18 = arith.constant 0 : index
    %c0_19 = arith.constant 0 : index
    %22 = vector.load %arg8[%c0_18, %c0_19] : memref<128x128xf32, #tpu.memory_space<vmem>>, vector<128x128xf32>
    %cst_20 = arith.constant dense<0.000000e+00> : vector<8x128xf32>
    %23 = tpu.matmul %21, %22, %cst_20 {dimension_numbers = #tpu.dot_dimension_numbers<[1], [0], [0], [1], [0, 0, 1, 1], [], []>, precision = #tpu.contract_precision<fp32>} : vector<8x128xf32>, vector<128x128xf32>, vector<8x128xf32> -> vector<8x128xf32>
    %c0_21 = arith.constant 0 : index
    %c0_22 = arith.constant 0 : index
    %24 = vector.load %arg9[%c0_21, %c0_22] : memref<1x128xf32, #tpu.memory_space<vmem>>, vector<1x128xf32>
    %25 = vector.broadcast %24 : vector<1x128xf32> to vector<8x128xf32>
    %26 = arith.addf %23, %25 : vector<8x128xf32>
    %cst_23 = arith.constant 0.000000e+00 : f32
    %27 = vector.broadcast %cst_23 : f32 to vector<8x128xf32>
    %28 = arith.maximumf %26, %27 : vector<8x128xf32>
    %c0_24 = arith.constant 0 : index
    %c0_25 = arith.constant 0 : index
    %29 = vector.load %arg10[%c0_24, %c0_25] : memref<128x3xf32, #tpu.memory_space<vmem>>, vector<128x3xf32>
    %cst_26 = arith.constant dense<0.000000e+00> : vector<8x3xf32>
    %30 = tpu.matmul %28, %29, %cst_26 {dimension_numbers = #tpu.dot_dimension_numbers<[1], [0], [0], [1], [0, 0, 1, 1], [], []>, precision = #tpu.contract_precision<fp32>} : vector<8x128xf32>, vector<128x3xf32>, vector<8x3xf32> -> vector<8x3xf32>
    %c0_27 = arith.constant 0 : index
    %c0_28 = arith.constant 0 : index
    %31 = vector.load %arg11[%c0_27, %c0_28] : memref<1x3xf32, #tpu.memory_space<vmem>>, vector<1x3xf32>
    %32 = vector.broadcast %31 : vector<1x3xf32> to vector<8x3xf32>
    %33 = arith.addf %30, %32 : vector<8x3xf32>
    %c0_29 = arith.constant 0 : index
    %c0_30 = arith.constant 0 : index
    %34 = vector.load %arg12[%c0_29, %c0_30] : memref<8x3xf32, #tpu.memory_space<vmem>>, vector<8x3xf32>
    tpu.vector_store %arg12[%c0_29, %c0_30], %33 {strides = array<i32>} : memref<8x3xf32, #tpu.memory_space<vmem>>, vector<8x3xf32>,
    return
  }
  func.func @transform_0(%arg0: i32) -> (i32, i32) {
    %c0_i32 = arith.constant 0 : i32
    %c0_i32_0 = arith.constant 0 : i32
    return %arg0, %c0_i32 : i32, i32
  }
  func.func @transform_1(%arg0: i32) -> (i32, i32) {
    %c0_i32 = arith.constant 0 : i32
    %c0_i32_0 = arith.constant 0 : i32
    %c0_i32_1 = arith.constant 0 : i32
    return %c0_i32, %c0_i32_0 : i32, i32
  }
  func.func @transform_2(%arg0: i32) -> (i32, i32) {
    %c0_i32 = arith.constant 0 : i32
    %c0_i32_0 = arith.constant 0 : i32
    %c0_i32_1 = arith.constant 0 : i32
    return %c0_i32, %c0_i32_0 : i32, i32
  }
  func.func @transform_3(%arg0: i32) -> (i32, i32) {
    %c0_i32 = arith.constant 0 : i32
    %c0_i32_0 = arith.constant 0 : i32
    %c0_i32_1 = arith.constant 0 : i32
    return %c0_i32, %c0_i32_0 : i32, i32
  }
  func.func @transform_4(%arg0: i32) -> (i32, i32) {
    %c0_i32 = arith.constant 0 : i32
    %c0_i32_0 = arith.constant 0 : i32
    %c0_i32_1 = arith.constant 0 : i32
    return %c0_i32, %c0_i32_0 : i32, i32
  }
  func.func @transform_5(%arg0: i32) -> (i32, i32) {
    %c0_i32 = arith.constant 0 : i32
    %c0_i32_0 = arith.constant 0 : i32
    %c0_i32_1 = arith.constant 0 : i32
    return %c0_i32, %c0_i32_0 : i32, i32
  }
  func.func @transform_6(%arg0: i32) -> (i32, i32) {
    %c0_i32 = arith.constant 0 : i32
    %c0_i32_0 = arith.constant 0 : i32
    %c0_i32_1 = arith.constant 0 : i32
    return %c0_i32, %c0_i32_0 : i32, i32
  }
  func.func @transform_7(%arg0: i32) -> (i32, i32) {
    %c0_i32 = arith.constant 0 : i32
    %c0_i32_0 = arith.constant 0 : i32
    %c0_i32_1 = arith.constant 0 : i32
    return %c0_i32, %c0_i32_0 : i32, i32
  }
  func.func @transform_8(%arg0: i32) -> (i32, i32) {
    %c0_i32 = arith.constant 0 : i32
    %c0_i32_0 = arith.constant 0 : i32
    %c0_i32_1 = arith.constant 0 : i32
    return %c0_i32, %c0_i32_0 : i32, i32
  }
  func.func @transform_9(%arg0: i32) -> (i32, i32) {
    %c0_i32 = arith.constant 0 : i32
    %c0_i32_0 = arith.constant 0 : i32
    %c0_i32_1 = arith.constant 0 : i32
    return %c0_i32, %c0_i32_0 : i32, i32
  }
  func.func @transform_10(%arg0: i32) -> (i32, i32) {
    %c0_i32 = arith.constant 0 : i32
    %c0_i32_0 = arith.constant 0 : i32
    %c0_i32_1 = arith.constant 0 : i32
    return %c0_i32, %c0_i32_0 : i32, i32
  }
  func.func @transform_11(%arg0: i32) -> (i32, i32) {
    %c0_i32 = arith.constant 0 : i32
    %c0_i32_0 = arith.constant 0 : i32
    return %arg0, %c0_i32 : i32, i32
  }
}

</mosaic_0001>

<bundles_post_ra>
// kernel: tpu_custom_call.1
= control target key start
LH: loop header
LB: loop body
LE: loop exit
PB: predicated region body
PF: predicated region fallthrough
CT: control target
= control target key end

     0   :  { %16 = vsyncpa [#allocation3], 0  ;;  %s6505_s0 = inlined_call_operand.vmem [shape: f32[8,4], index: 0, kind: input, shape index: {}]   ;;  %s6506_s1 = inlined_call_operand.vmem [shape: f32[4,128], index: 1, kind: input, shape index: {}]   ;;  %s6507_s2 = inlined_call_operand.vmem [shape: f32[1,128], index: 2, kind: input, shape index: {}]   ;;  %s6508_s3 = inlined_call_operand.vmem [shape: f32[128,128], index: 3, kind: input, shape index: {}]   ;;  %s6509_s4 = inlined_call_operand.vmem [shape: f32[1,128], index: 4, kind: input, shape index: {}]   ;;  %s6510_s5 = inlined_call_operand.hbm [shape: f32[128,128], index: 5, kind: input, shape index: {}]   ;;  %s6511_s6 = inlined_call_operand.vmem [shape: f32[1,128], index: 6, kind: input, shape index: {}]   ;;  %s6512_s7 = inlined_call_operand.hbm [shape: f32[128,128], index: 7, kind: input, shape index: {}]   ;;  %s6513_s8 = inlined_call_operand.vmem [shape: f32[1,128], index: 8, kind: input, shape index: {}]   ;;  %s6514_s9 = inlined_call_operand.vmem [shape: f32[128,3], index: 9, kind: input, shape index: {}]   ;;  %s6515_s10 = inlined_call_operand.vmem [shape: f32[1,3], index: 10, kind: input, shape index: {}]   ;;  %s6516_s11 = inlined_call_operand.vmem [shape: f32[8,3], index: 11, kind: output, shape index: {}]  }
   0x1   :  { %17 = vsyncpa [#allocation5], 0  ;;  %s5177_s17 = smov [#allocation2]   ;;  %s5129_s21 = scalar_lea.hbm %s6510_s5, 2048 }
   0x2   :  { %s33_s18 = sshll.u32 %s5177_s17, 4  ;;  %p5130_p0 = scmp.ne.s32.totalorder %s6510_s5, %s5129_s21  ;;  %s34_s18 = int_to_ptr.vmem [resolvable:$true] %s33_s18 }
   0x3   :  { %p5133_p1 = scmp.lt.u32.totalorder %s5129_s21, %s6510_s5 }
   0x5   :  { %p5135_p2 = pnand %p5133_p1, %p5130_p0 }
   0x7   :  { %5138 = shalt.err (!%p5135_p2)
}
   0x8   :  { %s5139_s26 = scalar_lea.vmem %s34_s18, 2048  ;;  %p5144_p4 = scmp.lt.s32.totalorder %s34_s18, %s34_s18 }
   0x9   :  { %p5140_p3 = scmp.ne.s32.totalorder %s34_s18, %s5139_s26  ;;  %p5145_p5 = scmp.lt.s32.totalorder %s5139_s26, %s5139_s26 }
   0xb   :  { %p5146_p6 = por %p5145_p5, %p5144_p4 }
   0xd   :  { %p5147_p7 = pnand %p5146_p6, %p5140_p3 }
   0xf   :  { %5150 = shalt.err (!%p5147_p7)
}
  0x10   :  { %s5178_s27 = smov 128   ;;  %s5179_s28 = smov 8  }
  0x11   :  { %39 = dma.hbm_to_vmem [thread:$0]  %s6510_s5, 2048, %s34_s18, [#allocation3], %s5178_s27, %s5178_s27, %s5179_s28  }
  0x12   :  { %s5180_s12 = smov [#allocation4]   ;;  %s5151_s16 = scalar_lea.hbm %s6512_s7, 2048 }
  0x13   :  { %s47_s13 = sshll.u32 %s5180_s12, 4  ;;  %p5152_p8 = scmp.ne.s32.totalorder %s6512_s7, %s5151_s16  ;;  %s48_s13 = int_to_ptr.vmem [resolvable:$true] %s47_s13 }
  0x14   :  { %p5155_p9 = scmp.lt.u32.totalorder %s5151_s16, %s6512_s7 }
  0x16   :  { %p5157_p10 = pnand %p5155_p9, %p5152_p8 }
  0x18   :  { %5160 = shalt.err (!%p5157_p10)
}
  0x19   :  { %s5161_s22 = scalar_lea.vmem %s48_s13, 2048  ;;  %p5166_p12 = scmp.lt.s32.totalorder %s48_s13, %s48_s13 }
  0x1a   :  { %p5162_p11 = scmp.ne.s32.totalorder %s48_s13, %s5161_s22  ;;  %p5167_p13 = scmp.lt.s32.totalorder %s5161_s22, %s5161_s22 }
  0x1c   :  { %p5168_p0 = por %p5167_p13, %p5166_p12 }
  0x1e   :  { %p5169_p1 = pnand %p5168_p0, %p5162_p11 }
  0x20   :  { %5172 = shalt.err (!%p5169_p1)
}
  0x21   :  { %53 = dma.hbm_to_vmem [thread:$0]  %s6512_s7, 2048, %s48_s13, [#allocation5], %s5178_s27, %s5178_s27, %s5179_s28  }
  0x22   :  { %5173 = dma.done.wait [#allocation3], 2048  }
  0x23   :  { %5174 = vsyncadd [#allocation3], 4294965248 }
  0x24   :  { %5175 = dma.done.wait [#allocation5], 2048  }
  0x25   :  { %5176 = vsyncadd [#allocation5], 4294965248  ;;  %v5181_v0 = vmov 0.0   ;;  %vm5182_vm0 = vmmov 0   ;;  %vm79_vm1 = vcmask 1043456   ;;  %vm75_vm2 = vcmask 31744  }
  0x26   :  { %3637 = vmatprep.subr.mxu0 %v5181_v0  ;;  %3639 = vmatprep.mubr.msk.f32.mxu0 %vm5182_vm0, %v5181_v0  ;;  %v67_v1 = vld [vmem:[%s6506_s1] sm:$0xf]  ;;  %v531_v6 = vld [vmem:[%s6508_s3 + $0x8] sm:$0xff]  ;;  %v532_v8 = vld [vmem:[%s6508_s3 + $0x10] sm:$0xff]  ;;  %v5183_v33 = vmov 0.0|0.0   ;;  %vm3189_vm3 = vcmask 23552  }
  0x27   :  { %3622 = vmatprep.subr.mxu1 %v5181_v0  ;;  %3624 = vmatprep.mubr.msk.f32.mxu1 %vm5182_vm0, %v5181_v0  ;;  %v66_v2 = vld [vmem:[%s6505_s0] sm:$0xff]  ;;  %v81_v4 = vsel %vm79_vm1, %v67_v1, 0  ;;  %v533_v9 = vld [vmem:[%s6508_s3 + $0x18] sm:$0xff]  ;;  %v535_v13 = vld [vmem:[%s6508_s3 + $0x28] sm:$0xff]  ;;  %v557_v14 = vand.u32 4294901760, %v531_v6  ;;  %v560_v16 = vand.u32 4294901760, %v532_v8 }
  0x28   :  { %v530_v3 = vld [vmem:[%s6508_s3] sm:$0xff]  ;;  %v77_v5 = vsel %vm75_vm2, %v66_v2, 0  ;;  %v84_v10 = vand.u32 4294901760, %v81_v4  ;;  %v563_v19 = vand.u32 4294901760, %v533_v9  ;;  %v569_v23 = vand.u32 4294901760, %v535_v13  ;;  %v536_v37 = vld [vmem:[%s6508_s3 + $0x30] sm:$0xff] }
  0x29   :  { %v554_v7 = vand.u32 4294901760, %v530_v3  ;;  %v149_v11 = vand.u32 4294901760, %v77_v5  ;;  %v534_v12 = vld [vmem:[%s6508_s3 + $0x20] sm:$0xff]  ;;  %v5302_v20 = vsub.f32 %v531_v6, %v557_v14  ;;  %v5304_v21 = vsub.f32 %v532_v8, %v560_v16  ;;  %v537_v38 = vld [vmem:[%s6508_s3 + $0x38] sm:$0xff]  ;;  %v539_v43 = vld [vmem:[%s6508_s3 + $0x48] sm:$0xff] }
  0x2a   :  { %v161_v17 = vsub.f32 %v81_v4, %v84_v10  ;;  %3638 = vmatpush3.msra.mxu0 %v84_v10  ;;  %3623 = vmatpush3.msra.mxu1 %v84_v10  ;;  %v566_v22 = vand.u32 4294901760, %v534_v12  ;;  %v5306_v26 = vsub.f32 %v533_v9, %v563_v19  ;;  %v5310_v28 = vsub.f32 %v535_v13, %v569_v23  ;;  %v538_v42 = vld [vmem:[%s6508_s3 + $0x40] sm:$0xff]  ;;  %v540_v49 = vld [vmem:[%s6508_s3 + $0x50] sm:$0xff]  ;;  %v541_v50 = vld [vmem:[%s6508_s3 + $0x58] sm:$0xff] }
  0x2b   :  { %v5298_v15 = vsub.f32 %v530_v3, %v554_v7  ;;  %v150_v18 = vsub.f32 %v77_v5, %v149_v11  ;;  %3627 = vmatprep.subr.mxu1 %v5181_v0  ;;  %3642 = vmatprep.subr.mxu0 %v5181_v0  ;;  %v5324_v34 = vpack.c.bf16 %v557_v14, %v554_v7  ;;  %v572_v39 = vand.u32 4294901760, %v536_v37  ;;  %v542_v54 = vld [vmem:[%s6508_s3 + $0x60] sm:$0xff]  ;;  %v543_v55 = vld [vmem:[%s6508_s3 + $0x68] sm:$0xff]  ;;  %v544_v59 = vld [vmem:[%s6508_s3 + $0x70] sm:$0xff] }
  0x2c   :  { %v162_v25 = vand.u32 4294901760, %v161_v17  ;;  %v5308_v27 = vsub.f32 %v534_v12, %v566_v22  ;;  %v5329_v35 = vpack.c.bf16 %v563_v19, %v560_v16  ;;  %v5335_v36 = vpack.c.bf16 %v569_v23, %v566_v22  ;;  %v545_v60 = vld [vmem:[%s6508_s3 + $0x78] sm:$0xff] }
  0x2d   :  { %v151_v24 = vand.u32 4294901760, %v150_v18  ;;  %v575_v40 = vand.u32 4294901760, %v537_v38  ;;  %v5355_v44 = vsub.f32 %v536_v37, %v572_v39  ;;  %v578_v46 = vand.u32 4294901760, %v538_v42 }
  0x2e   :  { %v163_v30 = vsub.f32 %v161_v17, %v162_v25  ;;  %v581_v47 = vand.u32 4294901760, %v539_v43  ;;  %v584_v51 = vand.u32 4294901760, %v540_v49  ;;  %v587_v52 = vand.u32 4294901760, %v541_v50 }
  0x2f   :  { %3640 = vmatmul.mubr.f32.vlgmr.msra.gmra.mrb[0].mxu0 %v151_v24  ;;  %v152_v29 = vsub.f32 %v150_v18, %v151_v24  ;;  %v5346_v41 = vpack.c.bf16 %v575_v40, %v572_v39  ;;  %v5357_v45 = vsub.f32 %v537_v38, %v575_v40  ;;  %v590_v56 = vand.u32 4294901760, %v542_v54 }
  0x30   :  { %3643 = vmatpush3.msra.mxu0 %v162_v25  ;;  %3644 = vmatprep.mubr.msk.f32.mxu0 %vm5182_vm0, %v5181_v0  ;;  %v164_v32 = vand.u32 4294901760, %v163_v30  ;;  %v5360_v48 = vpack.c.bf16 %v581_v47, %v578_v46  ;;  %v5370_v53 = vpack.c.bf16 %v587_v52, %v584_v51  ;;  %v593_v57 = vand.u32 4294901760, %v543_v55 }
  0x31   :  { %v153_v31 = vand.u32 4294901760, %v152_v29  ;;  %3647 = vmatprep.subr.mxu0 %v5181_v0  ;;  %v596_v61 = vand.u32 4294901760, %v544_v59  ;;  %v599_v62 = vand.u32 4294901760, %v545_v60  ;;  %v647_v63 = vand.u32 4294901760, %v5298_v15 }
  0x32   :  { %v5380_v58 = vpack.c.bf16 %v593_v57, %v590_v56  ;;  %v654_v1 = vand.u32 4294901760, %v5302_v20  ;;  %v5392_v2 = vsub.f32 %v538_v42, %v578_v46  ;;  %v5394_v3 = vsub.f32 %v539_v43, %v581_v47 }
  0x33   :  { %3625 = vmatmul.mubr.f32.vlgmr.msra.gmra.mrb[0].mxu1 %v153_v31  ;;  %v5396_v4 = vsub.f32 %v540_v49, %v584_v51  ;;  %v5398_v5 = vsub.f32 %v541_v50, %v587_v52  ;;  %v5400_v6 = vsub.f32 %v542_v54, %v590_v56  ;;  %v5402_v7 = vsub.f32 %v543_v55, %v593_v57 }
  0x34   :  { %3628 = vmatpush3.msra.mxu1 %v164_v32  ;;  %3629 = vmatprep.mubr.msk.f32.mxu1 %vm5182_vm0, %v5181_v0  ;;  %v5404_v8 = vpack.c.bf16 %v599_v62, %v596_v61  ;;  %v5406_v9 = vsub.f32 %v544_v59, %v596_v61  ;;  %v655_v12 = vsub.f32 %v5302_v20, %v654_v1  ;;  %v661_v13 = vand.u32 4294901760, %v5304_v21 }
  0x35   :  { %3632 = vmatprep.subr.mxu1 %v5181_v0  ;;  %v668_v14 = vand.u32 4294901760, %v5306_v26  ;;  %v6528_v25 = vand.u32 4294901760, %v5308_v27  ;;  %v6527_v29 = vand.u32 4294901760, %v5310_v28  ;;  %v6526_v39 = vand.u32 4294901760, %v5355_v44 }
  0x36   :  { %v6525_v40 = vand.u32 4294901760, %v5357_v45  ;;  %v6524_v50 = vand.u32 4294901760, %v5392_v2  ;;  %v6523_v51 = vand.u32 4294901760, %v5394_v3  ;;  %v6522_v59 = vand.u32 4294901760, %v5396_v4 }
  0x37   :  { %3645 = vmatmul.mubr.f32.vlgmr.msra.gmra.mrb[0].mxu0 %v149_v11  ;;  %v669_v19 = vsub.f32 %v5306_v26, %v668_v14  ;;  %v676_v31 = vsub.f32 %v5308_v27, %v6528_v25  ;;  %v683_v32 = vsub.f32 %v5310_v28, %v6527_v29  ;;  %v690_v43 = vsub.f32 %v5355_v44, %v6526_v39 }
  0x38   :  { %3648 = vmatpush3.msra.mxu0 %v84_v10  ;;  %3649 = vmatprep.mubr.msk.f32.mxu0 %vm5182_vm0, %v5181_v0  ;;  %v5408_v10 = vsub.f32 %v545_v60, %v599_v62  ;;  %v697_v46 = vsub.f32 %v5357_v45, %v6525_v40  ;;  %v704_v54 = vsub.f32 %v5392_v2, %v6524_v50  ;;  %v6521_v60 = vand.u32 4294901760, %v5398_v5  ;;  %v1204_v50 = vld [vmem:[#allocation2 + $0x48] sm:$0xff] }
  0x39   :  { %4636 = vmatprep.subr.bf16.mxu0 %v5183_v33  ;;  %v670_v24 = vand.u32 4294901760, %v669_v19  ;;  %v677_v37 = vand.u32 4294901760, %v676_v31  ;;  %v684_v38 = vand.u32 4294901760, %v683_v32  ;;  %v691_v47 = vand.u32 4294901760, %v690_v43 }
  0x3a   :  { %v698_v49 = vand.u32 4294901760, %v697_v46  ;;  %v711_v55 = vsub.f32 %v5394_v3, %v6523_v51  ;;  %v705_v56 = vand.u32 4294901760, %v704_v54  ;;  %v718_v62 = vsub.f32 %v5396_v4, %v6522_v59 }
  0x3b   :  { %3630 = vmatmul.mubr.f32.vlgmr.msra.gmra.mrb[0].mxu1 %v149_v11  ;;  %v4523_v42 = vpack.c.bf16 %v684_v38, %v677_v37  ;;  %v6518_v37 = vand.u32 4294901760, %v5406_v9  ;;  %v6517_v38 = vand.u32 4294901760, %v5408_v10 }
  0x3c   :  { %3633 = vmatpush3.msra.mxu1 %v161_v17  ;;  %3634 = vmatprep.mubr.msk.f32.mxu1 %vm5182_vm0, %v5181_v0  ;;  %v656_v17 = vand.u32 4294901760, %v655_v12  ;;  %v4526_v52 = vpack.c.bf16 %v698_v49, %v691_v47  ;;  %v712_v57 = vand.u32 4294901760, %v711_v55  ;;  %v719_v12 = vand.u32 4294901760, %v718_v62 }
  0x3d   :  { %4492 = vmatprep.subr.bf16.mxu1 %v5183_v33  ;;  %v746_v46 = vsub.f32 %v5406_v9, %v6518_v37  ;;  %v753_v47 = vsub.f32 %v5408_v10, %v6517_v38  ;;  %v4547_v62 = vpack.c.bf16 %v5310_v28, %v5308_v27 }
  0x3e   :  { %v4529_v61 = vpack.c.bf16 %v712_v57, %v705_v56  ;;  %v4541_v56 = vpack.c.bf16 %v5302_v20, %v5298_v15  ;;  %v4544_v57 = vpack.c.bf16 %v5306_v26, %v5304_v21  ;;  %v6560_v20 = vand.u32 4294901760, %v5310_v28 }
  0x3f   :  { %3650 = vmatmul.mubr.f32.vlgmr.msra.gmra.mrb[0].mxu0 %v149_v11  ;;  %v648_v11 = vsub.f32 %v5298_v15, %v647_v63  ;;  %v747_v49 = vand.u32 4294901760, %v746_v46  ;;  %v754_v54 = vand.u32 4294901760, %v753_v47  ;;  %v3197_v46 = vld [vmem:[%s6507_s2] ss:$0 sm:$0xff]  ;;  %v6559_v15 = vand.u32 4294901760, %v5308_v27 }
  0x40   :  { %3894 = vmatprep.mubr.msk.f32.mxu0 %vm5182_vm0, %v5181_v0  ;;  %v6565_v27 = vand.u32 4294901760, %v5396_v4  ;;  %v6566_v28 = vand.u32 4294901760, %v5398_v5 }
  0x41   :  { %v649_v16 = vand.u32 4294901760, %v648_v11  ;;  %v725_v11 = vsub.f32 %v5398_v5, %v6521_v60  ;;  %v4538_v55 = vpack.c.bf16 %v754_v54, %v747_v49 }
  0x43   :  { %3635 = vmatmul.mubr.f32.vlgmr.msra.gmra.mrb[0].mxu1 %v150_v18  ;;  %v662_v18 = vsub.f32 %v5304_v21, %v661_v13  ;;  %v5426_v22 = vpack.c.bf16 %v656_v17, %v649_v16  ;;  %v726_v16 = vand.u32 4294901760, %v725_v11  ;;  %v6520_v17 = vand.u32 4294901760, %v5400_v6 }
  0x44   :  { %4494 = vmatpush3.bf16.msra.mxu1 %v5324_v34  ;;  %3684 = vmatprep.mubr.msk.f32.mxu1 %vm5182_vm0, %v5181_v0  ;;  %v4550_v11 = vpack.c.bf16 %v5357_v45, %v5355_v44  ;;  %v6562_v21 = vand.u32 4294901760, %v5357_v45  ;;  %v6568_v45 = vand.u32 4294901760, %v5402_v7 }
  0x45   :  { %4495 = vmatprep.subr.bf16.mxu1 %v5183_v33  ;;  %v663_v23 = vand.u32 4294901760, %v662_v18  ;;  %v6519_v18 = vand.u32 4294901760, %v5402_v7  ;;  %v4532_v19 = vpack.c.bf16 %v726_v16, %v719_v12  ;;  %v4553_v12 = vpack.c.bf16 %v5394_v3, %v5392_v2 }
  0x46   :  { %v4556_v16 = vpack.c.bf16 %v5398_v5, %v5396_v4  ;;  %v1208_v4 = vld [vmem:[#allocation2 + $0x68] sm:$0xff] }
  0x47   :  { %v5430_v30 = vpack.c.bf16 %v670_v24, %v663_v23  ;;  %v732_v23 = vsub.f32 %v5400_v6, %v6520_v17  ;;  %v739_v24 = vsub.f32 %v5402_v7, %v6519_v18  ;;  %v1258_v5 = vand.u32 4294901760, %v1208_v4 }
  0x48   :  { %4497 = vmatpush3.bf16.msra.mxu1 %v5329_v35 }
  0x49   :  { %4498 = vmatprep.subr.bf16.mxu1 %v5183_v33  ;;  %v733_v31 = vand.u32 4294901760, %v732_v23  ;;  %v740_v32 = vand.u32 4294901760, %v739_v24  ;;  %v4559_v23 = vpack.c.bf16 %v5402_v7, %v5400_v6  ;;  %v4562_v24 = vpack.c.bf16 %v5408_v10, %v5406_v9  ;;  %v1209_v7 = vld [vmem:[#allocation2 + $0x70] sm:$0xff] }
  0x4b   :  { %v4535_v43 = vpack.c.bf16 %v740_v32, %v733_v31 }
  0x4c   :  { %4500 = vmatpush3.bf16.msra.mxu1 %v5335_v36 }
  0x4d   :  { %4501 = vmatprep.subr.bf16.mxu1 %v5183_v33 }
  0x50   :  { %4503 = vmatpush3.bf16.msra.mxu1 %v5346_v41 }
  0x51   :  { %4504 = vmatprep.subr.bf16.mxu1 %v5183_v33 }
  0x54   :  { %4506 = vmatpush3.bf16.msra.mxu1 %v5360_v48 }
  0x55   :  { %4507 = vmatprep.subr.bf16.mxu1 %v5183_v33 }
  0x58   :  { %4509 = vmatpush3.bf16.msra.mxu1 %v5370_v53 }
  0x59   :  { %4510 = vmatprep.subr.bf16.mxu1 %v5183_v33 }
  0x5c   :  { %4512 = vmatpush3.bf16.msra.mxu1 %v5380_v58 }
  0x5d   :  { %4513 = vmatprep.subr.bf16.mxu1 %v5183_v33 }
  0x60   :  { %4515 = vmatpush3.bf16.msra.mxu1 %v5404_v8 }
  0x61   :  { %4516 = vmatprep.subr.bf16.mxu1 %v5183_v33 }
 0x112   :  { %v525_v31 = vpop.f32.mrb[0].mxu0 }
 0x113   :  { %v3651_v32 = vpop.f32.mrb[1].mxu0 }
 0x116   :  { %v305_v47 = vpop.f32.mrb[0].mxu1 }
 0x117   :  { %v5068_v49 = vadd.f32 %v3197_v46, %v305_v47  ;;  %v3636_v54 = vpop.f32.mrb[1].mxu1  ;;  %v1201_v46 = vld [vmem:[#allocation2 + $0x30] sm:$0xff]  ;;  %v1202_v47 = vld [vmem:[#allocation2 + $0x38] sm:$0xff] }
 0x119   :  { %v5069_v38 = vadd.f32 %v5068_v49, %v525_v31  ;;  %v1203_v49 = vld [vmem:[#allocation2 + $0x40] sm:$0xff] }
 0x11b   :  { %v529_v37 = vmax.f32 %v5069_v38, 0.0  ;;  %v1200_v38 = vld [vmem:[#allocation2 + $0x28] sm:$0xff] }
 0x11c   :  { %v1234_v31 = vand.u32 4294901760, %v1200_v38 }
 0x11d   :  { %v5497_v18 = vand.u32 4294901760, %v529_v37 }
 0x11e   :  { %v5540_v25 = vsub.f32 %v1200_v38, %v1234_v31 }
 0x11f   :  { %v5500_v17 = vsub.f32 %v529_v37, %v5497_v18  ;;  %v1199_v37 = vld [vmem:[#allocation2 + $0x20] sm:$0xff] }
 0x121   :  { %v636_v60 = vand.u32 4294901760, %v5500_v17 }
 0x123   :  { %v637_v32 = vsub.f32 %v5500_v17, %v636_v60 }
 0x125   :  { %v638_v59 = vand.u32 4294901760, %v637_v32 }
 0x127   :  { %3685 = vmatmul.mubr.f32.vlgmr.msra.gmra.mrb[2].mxu1 %v638_v59 }
 0x128   :  { %4518 = vmatpush3.bf16.msra.mxu1 %v5426_v22  ;;  %3719 = vmatprep.mubr.msk.f32.mxu1 %vm5182_vm0, %v5181_v0  ;;  %v1195_v22 = vld [vmem:[#allocation2] sm:$0xff] }
 0x129   :  { %4519 = vmatprep.subr.bf16.mxu1 %v5183_v33 }
 0x12c   :  { %4521 = vmatpush3.bf16.msra.mxu1 %v5430_v30  ;;  %v1196_v30 = vld [vmem:[#allocation2 + $0x8] sm:$0xff] }
 0x12d   :  { %4522 = vmatprep.subr.bf16.mxu1 %v5183_v33  ;;  %v1222_v59 = vand.u32 4294901760, %v1196_v30 }
 0x12f   :  { %v5526_v32 = vsub.f32 %v1196_v30, %v1222_v59  ;;  %v1240_v30 = vand.u32 4294901760, %v1202_v47 }
 0x130   :  { %4524 = vmatpush3.bf16.msra.mxu1 %v4523_v42  ;;  %v1197_v42 = vld [vmem:[#allocation2 + $0x10] sm:$0xff] }
 0x131   :  { %4525 = vmatprep.subr.bf16.mxu1 %v5183_v33 }
 0x134   :  { %4527 = vmatpush3.bf16.msra.mxu1 %v4526_v52  ;;  %v1219_v52 = vand.u32 4294901760, %v1195_v22 }
 0x135   :  { %4528 = vmatprep.subr.bf16.mxu1 %v5183_v33 }
 0x136   :  { %v5522_v54 = vpack.c.bf16 %v1222_v59, %v1219_v52 }
 0x138   :  { %4530 = vmatpush3.bf16.msra.mxu1 %v4529_v61  ;;  %v1198_v61 = vld [vmem:[#allocation2 + $0x18] sm:$0xff]  ;;  %4638 = vmatpush3.bf16.msra.mxu0 %v5522_v54 }
 0x139   :  { %4531 = vmatprep.subr.bf16.mxu1 %v5183_v33  ;;  %4639 = vmatprep.subr.bf16.mxu0 %v5183_v33 }
 0x13c   :  { %4533 = vmatpush3.bf16.msra.mxu1 %v4532_v19  ;;  %v1225_v19 = vand.u32 4294901760, %v1197_v42 }
 0x13d   :  { %4534 = vmatprep.subr.bf16.mxu1 %v5183_v33 }
 0x13e   :  { %v5528_v51 = vsub.f32 %v1197_v42, %v1225_v19  ;;  %v1246_v42 = vand.u32 4294901760, %v1204_v50 }
 0x140   :  { %4536 = vmatpush3.bf16.msra.mxu1 %v4535_v43  ;;  %v1228_v43 = vand.u32 4294901760, %v1198_v61 }
 0x141   :  { %4537 = vmatprep.subr.bf16.mxu1 %v5183_v33 }
 0x142   :  { %v5530_v40 = vpack.c.bf16 %v1228_v43, %v1225_v19  ;;  %v5532_v39 = vsub.f32 %v1198_v61, %v1228_v43  ;;  %v5546_v61 = vsub.f32 %v1202_v47, %v1240_v30 }
 0x144   :  { %4539 = vmatpush3.bf16.msra.mxu1 %v4538_v55  ;;  %v1231_v55 = vand.u32 4294901760, %v1199_v37  ;;  %4641 = vmatpush3.bf16.msra.mxu0 %v5530_v40 }
 0x145   :  { %4540 = vmatprep.subr.bf16.mxu1 %v5183_v33  ;;  %4642 = vmatprep.subr.bf16.mxu0 %v5183_v33 }
 0x146   :  { %v5534_v29 = vsub.f32 %v1199_v37, %v1231_v55  ;;  %v5550_v37 = vsub.f32 %v1204_v50, %v1246_v42 }
 0x147   :  { %3720 = vmatmul.mubr.f32.vlgmr.msra.gmra.mrb[2].mxu1 %v5497_v18 }
 0x148   :  { %4542 = vmatpush3.bf16.msra.mxu1 %v4541_v56  ;;  %3754 = vmatprep.mubr.msk.f32.mxu1 %vm5182_vm0, %v5181_v0  ;;  %v5524_v56 = vsub.f32 %v1195_v22, %v1219_v52  ;;  %v1237_v22 = vand.u32 4294901760, %v1201_v46  ;;  %v1243_v52 = vand.u32 4294901760, %v1203_v49 }
 0x149   :  { %4543 = vmatprep.subr.bf16.mxu1 %v5183_v33 }
 0x14a   :  { %v5544_v59 = vsub.f32 %v1201_v46, %v1237_v22  ;;  %v5548_v19 = vsub.f32 %v1203_v49, %v1243_v52  ;;  %v5564_v50 = vpack.c.bf16 %v1240_v30, %v1237_v22  ;;  %v5699_v49 = vsub.f32 %v1208_v4, %v1258_v5 }
 0x14c   :  { %4545 = vmatpush3.bf16.msra.mxu1 %v4544_v57  ;;  %v5556_v57 = vpack.c.bf16 %v1234_v31, %v1231_v55 }
 0x14d   :  { %4546 = vmatprep.subr.bf16.mxu1 %v5183_v33 }
 0x14e   :  { %4644 = vmatpush3.bf16.msra.mxu0 %v5556_v57 }
 0x14f   :  { %4645 = vmatprep.subr.bf16.mxu0 %v5183_v33 }
 0x150   :  { %4548 = vmatpush3.bf16.msra.mxu1 %v4547_v62  ;;  %v5572_v62 = vpack.c.bf16 %v1246_v42, %v1243_v52 }
 0x151   :  { %4549 = vmatprep.subr.bf16.mxu1 %v5183_v33 }
 0x152   :  { %4647 = vmatpush3.bf16.msra.mxu0 %v5564_v50 }
 0x153   :  { %4648 = vmatprep.subr.bf16.mxu0 %v5183_v33 }
 0x154   :  { %4551 = vmatpush3.bf16.msra.mxu1 %v4550_v11  ;;  %v4589_v11 = vpack.c.bf16 %v654_v1, %v647_v63  ;;  %v4595_v63 = vpack.c.bf16 %v6560_v20, %v6559_v15  ;;  %v6561_v1 = vand.u32 4294901760, %v5355_v44  ;;  %v6567_v44 = vand.u32 4294901760, %v5400_v6 }
 0x155   :  { %4552 = vmatprep.subr.bf16.mxu1 %v5183_v33 }
 0x156   :  { %4650 = vmatpush3.bf16.msra.mxu0 %v5572_v62  ;;  %v4598_v26 = vpack.c.bf16 %v6562_v21, %v6561_v1  ;;  %v6540_v1 = vand.u32 4294901760, %v5534_v29  ;;  %v6539_v21 = vand.u32 4294901760, %v5540_v25 }
 0x157   :  { %4651 = vmatprep.subr.bf16.mxu0 %v5183_v33 }
 0x158   :  { %4554 = vmatpush3.bf16.msra.mxu1 %v4553_v12  ;;  %v4592_v12 = vpack.c.bf16 %v668_v14, %v661_v13  ;;  %v6563_v13 = vand.u32 4294901760, %v5392_v2  ;;  %v6564_v14 = vand.u32 4294901760, %v5394_v3  ;;  %v6569_v2 = vand.u32 4294901760, %v5406_v9 }
 0x159   :  { %4555 = vmatprep.subr.bf16.mxu1 %v5183_v33  ;;  %v6570_v3 = vand.u32 4294901760, %v5408_v10  ;;  %v1261_v9 = vand.u32 4294901760, %v1209_v7 }
 0x15b   :  { %v5702_v22 = vsub.f32 %v1209_v7, %v1261_v9 }
 0x15c   :  { %4557 = vmatpush3.bf16.msra.mxu1 %v4556_v16  ;;  %v4607_v16 = vpack.c.bf16 %v6568_v45, %v6567_v44  ;;  %v6538_v44 = vand.u32 4294901760, %v5544_v59  ;;  %v6537_v45 = vand.u32 4294901760, %v5546_v61 }
 0x15d   :  { %4558 = vmatprep.subr.bf16.mxu1 %v5183_v33 }
 0x160   :  { %4560 = vmatpush3.bf16.msra.mxu1 %v4559_v23  ;;  %v4610_v23 = vpack.c.bf16 %v6570_v3, %v6569_v2  ;;  %v1355_v2 = vsub.f32 %v5544_v59, %v6538_v44  ;;  %v1362_v3 = vsub.f32 %v5546_v61, %v6537_v45 }
 0x161   :  { %4561 = vmatprep.subr.bf16.mxu1 %v5183_v33 }
 0x164   :  { %4563 = vmatpush3.bf16.msra.mxu1 %v4562_v24  ;;  %v1319_v24 = vand.u32 4294901760, %v5526_v32 }
 0x165   :  { %4564 = vmatprep.subr.bf16.mxu1 %v5183_v33 }
 0x166   :  { %v1320_v55 = vsub.f32 %v5526_v32, %v1319_v24 }
 0x167   :  { %3755 = vmatmul.mubr.f32.vlgmr.msra.gmra.mrb[2].mxu1 %v5500_v17  ;;  %v4604_v17 = vpack.c.bf16 %v6566_v28, %v6565_v27 }
 0x168   :  { %4566 = vmatpush3.bf16.msra.mxu1 %v5324_v34  ;;  %3789 = vmatprep.mubr.msk.f32.mxu1 %vm5182_vm0, %v5181_v0  ;;  %v1321_v42 = vand.u32 4294901760, %v1320_v55 }
 0x169   :  { %4567 = vmatprep.subr.bf16.mxu1 %v5183_v33 }
 0x16c   :  { %4569 = vmatpush3.bf16.msra.mxu1 %v5329_v35 }
 0x16d   :  { %4570 = vmatprep.subr.bf16.mxu1 %v5183_v33 }
 0x170   :  { %4572 = vmatpush3.bf16.msra.mxu1 %v5335_v36 }
 0x171   :  { %4573 = vmatprep.subr.bf16.mxu1 %v5183_v33 }
 0x174   :  { %4575 = vmatpush3.bf16.msra.mxu1 %v5346_v41 }
 0x175   :  { %4576 = vmatprep.subr.bf16.mxu1 %v5183_v33 }
 0x178   :  { %4578 = vmatpush3.bf16.msra.mxu1 %v5360_v48 }
 0x179   :  { %4579 = vmatprep.subr.bf16.mxu1 %v5183_v33 }
 0x17c   :  { %4581 = vmatpush3.bf16.msra.mxu1 %v5370_v53 }
 0x17d   :  { %4582 = vmatprep.subr.bf16.mxu1 %v5183_v33 }
 0x180   :  { %4584 = vmatpush3.bf16.msra.mxu1 %v5380_v58 }
 0x181   :  { %4585 = vmatprep.subr.bf16.mxu1 %v5183_v33 }
 0x184   :  { %4587 = vmatpush3.bf16.msra.mxu1 %v5404_v8 }
 0x185   :  { %4588 = vmatprep.subr.bf16.mxu1 %v5183_v33 }
 0x187   :  { %3790 = vmatmul.mubr.f32.vlgmr.msra.gmra.mrb[2].mxu1 %v636_v60  ;;  %v4601_v60 = vpack.c.bf16 %v6564_v14, %v6563_v13  ;;  %v1341_v14 = vsub.f32 %v5534_v29, %v6540_v1 }
 0x188   :  { %4590 = vmatpush3.bf16.msra.mxu1 %v4589_v11  ;;  %3824 = vmatprep.mubr.msk.f32.mxu1 %vm5182_vm0, %v5181_v0  ;;  %v6542_v11 = vand.u32 4294901760, %v5528_v51 }
 0x189   :  { %4591 = vmatprep.subr.bf16.mxu1 %v5183_v33  ;;  %v1342_v28 = vand.u32 4294901760, %v1341_v14 }
 0x18a   :  { %v1327_v20 = vsub.f32 %v5528_v51, %v6542_v11 }
 0x18c   :  { %4593 = vmatpush3.bf16.msra.mxu1 %v4592_v12  ;;  %v6541_v12 = vand.u32 4294901760, %v5532_v39 }
 0x18d   :  { %4594 = vmatprep.subr.bf16.mxu1 %v5183_v33 }
 0x190   :  { %4596 = vmatpush3.bf16.msra.mxu1 %v4595_v63  ;;  %v1334_v63 = vsub.f32 %v5532_v39, %v6541_v12 }
 0x191   :  { %4597 = vmatprep.subr.bf16.mxu1 %v5183_v33 }
 0x192   :  { %v1335_v13 = vand.u32 4294901760, %v1334_v63 }
 0x194   :  { %4599 = vmatpush3.bf16.msra.mxu1 %v4598_v26  ;;  %v1328_v26 = vand.u32 4294901760, %v1327_v20  ;;  %v6531_v20 = vand.u32 4294901760, %v5699_v49 }
 0x195   :  { %4600 = vmatprep.subr.bf16.mxu1 %v5183_v33 }
 0x196   :  { %v4664_v27 = vpack.c.bf16 %v1335_v13, %v1328_v26  ;;  %v1404_v13 = vsub.f32 %v5699_v49, %v6531_v20 }
 0x198   :  { %4602 = vmatpush3.bf16.msra.mxu1 %v4601_v60  ;;  %v1348_v60 = vsub.f32 %v5540_v25, %v6539_v21 }
 0x199   :  { %4603 = vmatprep.subr.bf16.mxu1 %v5183_v33 }
 0x19c   :  { %4605 = vmatpush3.bf16.msra.mxu1 %v4604_v17  ;;  %v1349_v17 = vand.u32 4294901760, %v1348_v60  ;;  %v1405_v60 = vand.u32 4294901760, %v1404_v13 }
 0x19d   :  { %4606 = vmatprep.subr.bf16.mxu1 %v5183_v33 }
 0x1a0   :  { %4608 = vmatpush3.bf16.msra.mxu1 %v4607_v16  ;;  %v4667_v16 = vpack.c.bf16 %v1349_v17, %v1342_v28  ;;  %v6530_v28 = vand.u32 4294901760, %v5702_v22 }
 0x1a1   :  { %4609 = vmatprep.subr.bf16.mxu1 %v5183_v33 }
 0x1a4   :  { %4611 = vmatpush3.bf16.msra.mxu1 %v4610_v23  ;;  %v1356_v23 = vand.u32 4294901760, %v1355_v2 }
 0x1a5   :  { %4612 = vmatprep.subr.bf16.mxu1 %v5183_v33 }
 0x1a7   :  { %3825 = vmatmul.mubr.f32.vlgmr.msra.gmra.mrb[2].mxu1 %v5497_v18 }
 0x1a8   :  { %4614 = vmatpush3.bf16.msra.mxu1 %v5324_v34  ;;  %3859 = vmatprep.mubr.msk.f32.mxu1 %vm5182_vm0, %v5181_v0  ;;  %v1205_v34 = vld [vmem:[#allocation2 + $0x50] sm:$0xff] }
 0x1a9   :  { %4615 = vmatprep.subr.bf16.mxu1 %v5183_v33 }
 0x1ac   :  { %4617 = vmatpush3.bf16.msra.mxu1 %v5329_v35  ;;  %v1206_v35 = vld [vmem:[#allocation2 + $0x58] sm:$0xff] }
 0x1ad   :  { %4618 = vmatprep.subr.bf16.mxu1 %v5183_v33 }
 0x1b0   :  { %4620 = vmatpush3.bf16.msra.mxu1 %v5335_v36  ;;  %v1249_v36 = vand.u32 4294901760, %v1205_v34 }
 0x1b1   :  { %4621 = vmatprep.subr.bf16.mxu1 %v5183_v33 }
 0x1b2   :  { %v5693_v31 = vsub.f32 %v1205_v34, %v1249_v36  ;;  %v1363_v34 = vand.u32 4294901760, %v1362_v3  ;;  %v1411_v3 = vsub.f32 %v5702_v22, %v6530_v28 }
 0x1b4   :  { %4623 = vmatpush3.bf16.msra.mxu1 %v5346_v41  ;;  %v1252_v41 = vand.u32 4294901760, %v1206_v35  ;;  %v6534_v7 = vand.u32 4294901760, %v5693_v31 }
 0x1b5   :  { %4624 = vmatprep.subr.bf16.mxu1 %v5183_v33 }
 0x1b6   :  { %v5695_v46 = vsub.f32 %v1206_v35, %v1252_v41  ;;  %v6536_v35 = vand.u32 4294901760, %v5548_v19 }
 0x1b8   :  { %4626 = vmatpush3.bf16.msra.mxu1 %v5360_v48  ;;  %v5675_v48 = vpack.c.bf16 %v1252_v41, %v1249_v36  ;;  %v6535_v36 = vand.u32 4294901760, %v5550_v37  ;;  %v4670_v41 = vpack.c.bf16 %v1363_v34, %v1356_v23  ;;  %v1412_v34 = vand.u32 4294901760, %v1411_v3 }
 0x1b9   :  { %4627 = vmatprep.subr.bf16.mxu1 %v5183_v33 }
 0x1ba   :  { %4653 = vmatpush3.bf16.msra.mxu0 %v5675_v48  ;;  %v1376_v4 = vsub.f32 %v5550_v37, %v6535_v36 }
 0x1bb   :  { %4654 = vmatprep.subr.bf16.mxu0 %v5183_v33 }
 0x1bc   :  { %4629 = vmatpush3.bf16.msra.mxu1 %v5370_v53  ;;  %v1207_v53 = vld [vmem:[#allocation2 + $0x60] sm:$0xff] }
 0x1bd   :  { %4630 = vmatprep.subr.bf16.mxu1 %v5183_v33 }
 0x1c0   :  { %4632 = vmatpush3.bf16.msra.mxu1 %v5380_v58  ;;  %v1255_v58 = vand.u32 4294901760, %v1207_v53 }
 0x1c1   :  { %4633 = vmatprep.subr.bf16.mxu1 %v5183_v33 }
 0x1c2   :  { %v5679_v6 = vpack.c.bf16 %v1258_v5, %v1255_v58  ;;  %v5697_v47 = vsub.f32 %v1207_v53, %v1255_v58  ;;  %v1369_v53 = vsub.f32 %v5548_v19, %v6536_v35  ;;  %v1377_v5 = vand.u32 4294901760, %v1376_v4  ;;  %v1869_v35 = vld [vmem:[#allocation4 + $0x48] sm:$0xff] }
 0x1c4   :  { %4635 = vmatpush3.bf16.msra.mxu1 %v5404_v8  ;;  %v1210_v8 = vld [vmem:[#allocation2 + $0x78] sm:$0xff]  ;;  %4656 = vmatpush3.bf16.msra.mxu0 %v5679_v6  ;;  %v1370_v58 = vand.u32 4294901760, %v1369_v53 }
 0x1c5   :  { %4780 = vmatprep.subr.bf16.mxu1 %v5183_v33  ;;  %v1264_v10 = vand.u32 4294901760, %v1210_v8  ;;  %4657 = vmatprep.subr.bf16.mxu0 %v5183_v33 }
 0x1c7   :  { %3860 = vmatmul.mubr.f32.vlgmr.msra.gmra.mrb[2].mxu1 %v5497_v18  ;;  %v1312_v18 = vand.u32 4294901760, %v5524_v56  ;;  %v5685_v38 = vpack.c.bf16 %v1264_v10, %v1261_v9  ;;  %v5704_v30 = vsub.f32 %v1210_v8, %v1264_v10  ;;  %v6533_v8 = vand.u32 4294901760, %v5695_v46 }
 0x1c8   :  { %4104 = vmatprep.mubr.msk.f32.mxu1 %vm5182_vm0, %v5181_v0  ;;  %v4673_v9 = vpack.c.bf16 %v1377_v5, %v1370_v58  ;;  %v1383_v10 = vsub.f32 %v5693_v31, %v6534_v7  ;;  %v4685_v58 = vpack.c.bf16 %v5526_v32, %v5524_v56  ;;  %v4688_v5 = vpack.c.bf16 %v5532_v39, %v5528_v51 }
 0x1c9   :  { %v1313_v43 = vsub.f32 %v5524_v56, %v1312_v18  ;;  %4659 = vmatpush3.bf16.msra.mxu0 %v5685_v38  ;;  %v6529_v17 = vand.u32 4294901760, %v5704_v30  ;;  %v4706_v13 = vpack.c.bf16 %v5704_v30, %v5702_v22  ;;  %v6573_v56 = vand.u32 4294901760, %v5534_v29 }
 0x1ca   :  { %4660 = vmatprep.subr.bf16.mxu0 %v5183_v33  ;;  %v1384_v55 = vand.u32 4294901760, %v1383_v10  ;;  %v4691_v10 = vpack.c.bf16 %v5540_v25, %v5534_v29  ;;  %v6574_v32 = vand.u32 4294901760, %v5540_v25  ;;  %v6579_v25 = vand.u32 4294901760, %v5693_v31 }
 0x1cb   :  { %v1314_v52 = vand.u32 4294901760, %v1313_v43  ;;  %v1390_v43 = vsub.f32 %v5695_v46, %v6533_v8  ;;  %v1418_v23 = vsub.f32 %v5704_v30, %v6529_v17  ;;  %v6580_v29 = vand.u32 4294901760, %v5695_v46 }
 0x1cd   :  { %v5709_v15 = vpack.c.bf16 %v1321_v42, %v1314_v52  ;;  %v1391_v52 = vand.u32 4294901760, %v1390_v43  ;;  %v6532_v42 = vand.u32 4294901760, %v5697_v47  ;;  %v1419_v53 = vand.u32 4294901760, %v1418_v23 }
 0x1ce   :  { %v4694_v43 = vpack.c.bf16 %v5546_v61, %v5544_v59 }
 0x1cf   :  { %v4676_v63 = vpack.c.bf16 %v1391_v52, %v1384_v55  ;;  %v1397_v26 = vsub.f32 %v5697_v47, %v6532_v42  ;;  %v4682_v4 = vpack.c.bf16 %v1419_v53, %v1412_v34  ;;  %v4697_v55 = vpack.c.bf16 %v5550_v37, %v5548_v19 }
 0x1d0   :  { %v4700_v52 = vpack.c.bf16 %v5695_v46, %v5693_v31  ;;  %v1873_v31 = vld [vmem:[#allocation4 + $0x68] sm:$0xff] }
 0x1d1   :  { %v1398_v14 = vand.u32 4294901760, %v1397_v26  ;;  %v4703_v26 = vpack.c.bf16 %v5699_v49, %v5697_v47  ;;  %v1923_v46 = vand.u32 4294901760, %v1873_v31 }
 0x1d3   :  { %v4679_v2 = vpack.c.bf16 %v1405_v60, %v1398_v14  ;;  %v3198_v14 = vld [vmem:[%s6509_s4] ss:$0 sm:$0xff] }
 0x29a   :  { %v1190_v60 = vpop.f32.mrb[2].mxu1 }
 0x29b   :  { %v5070_v3 = vadd.f32 %v3198_v14, %v1190_v60  ;;  %v3861_v23 = vpop.f32.mrb[3].mxu1 }
 0x29c   :  { %v1867_v23 = vld [vmem:[#allocation4 + $0x38] sm:$0xff] }
 0x29d   :  { %v1194_v34 = vmax.f32 %v5070_v3, 0.0  ;;  %v1866_v3 = vld [vmem:[#allocation4 + $0x30] sm:$0xff]  ;;  %v1905_v11 = vand.u32 4294901760, %v1867_v23 }
 0x29e   :  { %v1902_v12 = vand.u32 4294901760, %v1866_v3 }
 0x29f   :  { %v5784_v53 = vand.u32 4294901760, %v1194_v34 }
 0x2a1   :  { %v5787_v17 = vsub.f32 %v1194_v34, %v5784_v53  ;;  %v1868_v34 = vld [vmem:[#allocation4 + $0x40] sm:$0xff] }
 0x2a3   :  { %v1301_v28 = vand.u32 4294901760, %v5787_v17 }
 0x2a5   :  { %v1302_v20 = vsub.f32 %v5787_v17, %v1301_v28 }
 0x2a7   :  { %v1303_v42 = vand.u32 4294901760, %v1302_v20 }
 0x2a9   :  { %3895 = vmatmul.mubr.f32.vlgmr.msra.gmra.mrb[2].mxu0 %v1303_v42  ;;  %v1863_v42 = vld [vmem:[#allocation4 + $0x18] sm:$0xff] }
 0x2aa   :  { %4662 = vmatpush3.bf16.msra.mxu0 %v5709_v15  ;;  %3929 = vmatprep.mubr.msk.f32.mxu0 %vm5182_vm0, %v5181_v0  ;;  %v1860_v15 = vld [vmem:[#allocation4] sm:$0xff] }
 0x2ab   :  { %4663 = vmatprep.subr.bf16.mxu0 %v5183_v33 }
 0x2ae   :  { %4665 = vmatpush3.bf16.msra.mxu0 %v4664_v27  ;;  %v1861_v27 = vld [vmem:[#allocation4 + $0x8] sm:$0xff] }
 0x2af   :  { %4666 = vmatprep.subr.bf16.mxu0 %v5183_v33 }
 0x2b2   :  { %4668 = vmatpush3.bf16.msra.mxu0 %v4667_v16  ;;  %v1862_v16 = vld [vmem:[#allocation4 + $0x10] sm:$0xff] }
 0x2b3   :  { %4669 = vmatprep.subr.bf16.mxu0 %v5183_v33  ;;  %v1890_v20 = vand.u32 4294901760, %v1862_v16 }
 0x2b5   :  { %v5814_v36 = vsub.f32 %v1862_v16, %v1890_v20  ;;  %v5827_v16 = vsub.f32 %v1866_v3, %v1902_v12 }
 0x2b6   :  { %4671 = vmatpush3.bf16.msra.mxu0 %v4670_v41  ;;  %v1884_v41 = vand.u32 4294901760, %v1860_v15 }
 0x2b7   :  { %4672 = vmatprep.subr.bf16.mxu0 %v5183_v33 }
 0x2ba   :  { %4674 = vmatpush3.bf16.msra.mxu0 %v4673_v9  ;;  %v1887_v9 = vand.u32 4294901760, %v1861_v27 }
 0x2bb   :  { %4675 = vmatprep.subr.bf16.mxu0 %v5183_v33 }
 0x2bc   :  { %v5808_v8 = vpack.c.bf16 %v1887_v9, %v1884_v41  ;;  %v5812_v7 = vsub.f32 %v1861_v27, %v1887_v9  ;;  %v1911_v27 = vand.u32 4294901760, %v1869_v35 }
 0x2be   :  { %4677 = vmatpush3.bf16.msra.mxu0 %v4676_v63  ;;  %v1864_v63 = vld [vmem:[#allocation4 + $0x20] sm:$0xff]  ;;  %4782 = vmatpush3.bf16.msra.mxu1 %v5808_v8 }
 0x2bf   :  { %4678 = vmatprep.subr.bf16.mxu0 %v5183_v33  ;;  %v1896_v14 = vand.u32 4294901760, %v1864_v63  ;;  %4783 = vmatprep.subr.bf16.mxu1 %v5183_v33 }
 0x2c1   :  { %v5820_v21 = vsub.f32 %v1864_v63, %v1896_v14  ;;  %v1984_v63 = vand.u32 4294901760, %v5812_v7 }
 0x2c2   :  { %4680 = vmatpush3.bf16.msra.mxu0 %v4679_v2  ;;  %v1865_v2 = vld [vmem:[#allocation4 + $0x28] sm:$0xff] }
 0x2c3   :  { %4681 = vmatprep.subr.bf16.mxu0 %v5183_v33  ;;  %v1899_v60 = vand.u32 4294901760, %v1865_v2 }
 0x2c5   :  { %v5823_v1 = vsub.f32 %v1865_v2, %v1899_v60 }
 0x2c6   :  { %4683 = vmatpush3.bf16.msra.mxu0 %v4682_v4  ;;  %v1893_v4 = vand.u32 4294901760, %v1863_v42 }
 0x2c7   :  { %4684 = vmatprep.subr.bf16.mxu0 %v5183_v33 }
 0x2c8   :  { %v5816_v45 = vpack.c.bf16 %v1893_v4, %v1890_v20  ;;  %v5818_v44 = vsub.f32 %v1863_v42, %v1893_v4  ;;  %v5833_v42 = vsub.f32 %v1869_v35, %v1911_v27  ;;  %v5847_v35 = vpack.c.bf16 %v1905_v11, %v1902_v12 }
 0x2c9   :  { %3930 = vmatmul.mubr.f32.vlgmr.msra.gmra.mrb[2].mxu0 %v5784_v53  ;;  %v6571_v12 = vand.u32 4294901760, %v5528_v51  ;;  %v6576_v51 = vand.u32 4294901760, %v5546_v61  ;;  %v6582_v61 = vand.u32 4294901760, %v5699_v49  ;;  %v1875_v49 = vld [vmem:[#allocation4 + $0x78] sm:$0xff] }
 0x2ca   :  { %4686 = vmatpush3.bf16.msra.mxu0 %v4685_v58  ;;  %3964 = vmatprep.mubr.msk.f32.mxu0 %vm5182_vm0, %v5181_v0  ;;  %v5810_v58 = vsub.f32 %v1860_v15, %v1884_v41  ;;  %v1908_v15 = vand.u32 4294901760, %v1868_v34  ;;  %v5829_v41 = vsub.f32 %v1867_v23, %v1905_v11  ;;  %v4733_v11 = vpack.c.bf16 %v1319_v24, %v1312_v18 }
 0x2cb   :  { %4687 = vmatprep.subr.bf16.mxu0 %v5183_v33  ;;  %4785 = vmatpush3.bf16.msra.mxu1 %v5816_v45  ;;  %v4739_v18 = vpack.c.bf16 %v6574_v32, %v6573_v56  ;;  %v6575_v24 = vand.u32 4294901760, %v5544_v59  ;;  %v6581_v59 = vand.u32 4294901760, %v5697_v47  ;;  %v1874_v47 = vld [vmem:[#allocation4 + $0x70] sm:$0xff] }
 0x2cc   :  { %v5831_v9 = vsub.f32 %v1868_v34, %v1908_v15  ;;  %4786 = vmatprep.subr.bf16.mxu1 %v5183_v33  ;;  %v5982_v34 = vsub.f32 %v1873_v31, %v1923_v46 }
 0x2ce   :  { %4689 = vmatpush3.bf16.msra.mxu0 %v4688_v5  ;;  %v5839_v5 = vpack.c.bf16 %v1899_v60, %v1896_v14  ;;  %v1985_v14 = vsub.f32 %v5812_v7, %v1984_v63 }
 0x2cf   :  { %4690 = vmatprep.subr.bf16.mxu0 %v5183_v33 }
 0x2d0   :  { %4788 = vmatpush3.bf16.msra.mxu1 %v5839_v5 }
 0x2d1   :  { %4789 = vmatprep.subr.bf16.mxu1 %v5183_v33 }
 0x2d2   :  { %4692 = vmatpush3.bf16.msra.mxu0 %v4691_v10  ;;  %v5855_v10 = vpack.c.bf16 %v1911_v27, %v1908_v15 }
 0x2d3   :  { %4693 = vmatprep.subr.bf16.mxu0 %v5183_v33 }
 0x2d4   :  { %4791 = vmatpush3.bf16.msra.mxu1 %v5847_v35 }
 0x2d5   :  { %4792 = vmatprep.subr.bf16.mxu1 %v5183_v33 }
 0x2d6   :  { %4695 = vmatpush3.bf16.msra.mxu0 %v4694_v43  ;;  %v6572_v43 = vand.u32 4294901760, %v5532_v39  ;;  %v4742_v39 = vpack.c.bf16 %v6576_v51, %v6575_v24  ;;  %v6554_v24 = vand.u32 4294901760, %v5820_v21  ;;  %v6553_v51 = vand.u32 4294901760, %v5823_v1 }
 0x2d7   :  { %4696 = vmatprep.subr.bf16.mxu0 %v5183_v33 }
 0x2d8   :  { %4794 = vmatpush3.bf16.msra.mxu1 %v5855_v10 }
 0x2d9   :  { %4795 = vmatprep.subr.bf16.mxu1 %v5183_v33 }
 0x2da   :  { %4698 = vmatpush3.bf16.msra.mxu0 %v4697_v55  ;;  %v4736_v55 = vpack.c.bf16 %v6572_v43, %v6571_v12  ;;  %v1986_v12 = vand.u32 4294901760, %v1985_v14  ;;  %v1991_v43 = vand.u32 4294901760, %v5814_v36 }
 0x2db   :  { %4699 = vmatprep.subr.bf16.mxu0 %v5183_v33 }
 0x2dc   :  { %v1992_v32 = vsub.f32 %v5814_v36, %v1991_v43 }
 0x2de   :  { %4701 = vmatpush3.bf16.msra.mxu0 %v4700_v52 }
 0x2df   :  { %4702 = vmatprep.subr.bf16.mxu0 %v5183_v33 }
 0x2e2   :  { %4704 = vmatpush3.bf16.msra.mxu0 %v4703_v26  ;;  %v4748_v26 = vpack.c.bf16 %v6580_v29, %v6579_v25 }
 0x2e3   :  { %4705 = vmatprep.subr.bf16.mxu0 %v5183_v33 }
 0x2e6   :  { %4707 = vmatpush3.bf16.msra.mxu0 %v4706_v13  ;;  %v4751_v13 = vpack.c.bf16 %v6582_v61, %v6581_v59  ;;  %v6552_v59 = vand.u32 4294901760, %v5827_v16  ;;  %v6551_v61 = vand.u32 4294901760, %v5829_v41 }
 0x2e7   :  { %4708 = vmatprep.subr.bf16.mxu0 %v5183_v33 }
 0x2e9   :  { %3965 = vmatmul.mubr.f32.vlgmr.msra.gmra.mrb[2].mxu0 %v5787_v17  ;;  %v6578_v17 = vand.u32 4294901760, %v5550_v37  ;;  %v6584_v37 = vand.u32 4294901760, %v5704_v30  ;;  %v1929_v30 = vand.u32 4294901760, %v1875_v49 }
 0x2ea   :  { %4710 = vmatpush3.bf16.msra.mxu0 %v5522_v54  ;;  %3999 = vmatprep.mubr.msk.f32.mxu0 %vm5182_vm0, %v5181_v0 }
 0x2eb   :  { %4711 = vmatprep.subr.bf16.mxu0 %v5183_v33  ;;  %v5987_v27 = vsub.f32 %v1875_v49, %v1929_v30 }
 0x2ee   :  { %4713 = vmatpush3.bf16.msra.mxu0 %v5530_v40 }
 0x2ef   :  { %4714 = vmatprep.subr.bf16.mxu0 %v5183_v33 }
 0x2f2   :  { %4716 = vmatpush3.bf16.msra.mxu0 %v5556_v57 }
 0x2f3   :  { %4717 = vmatprep.subr.bf16.mxu0 %v5183_v33 }
 0x2f6   :  { %4719 = vmatpush3.bf16.msra.mxu0 %v5564_v50 }
 0x2f7   :  { %4720 = vmatprep.subr.bf16.mxu0 %v5183_v33 }
 0x2fa   :  { %4722 = vmatpush3.bf16.msra.mxu0 %v5572_v62 }
 0x2fb   :  { %4723 = vmatprep.subr.bf16.mxu0 %v5183_v33 }
 0x2fe   :  { %4725 = vmatpush3.bf16.msra.mxu0 %v5675_v48 }
 0x2ff   :  { %4726 = vmatprep.subr.bf16.mxu0 %v5183_v33 }
 0x302   :  { %4728 = vmatpush3.bf16.msra.mxu0 %v5679_v6 }
 0x303   :  { %4729 = vmatprep.subr.bf16.mxu0 %v5183_v33 }
 0x306   :  { %4731 = vmatpush3.bf16.msra.mxu0 %v5685_v38 }
 0x307   :  { %4732 = vmatprep.subr.bf16.mxu0 %v5183_v33 }
 0x309   :  { %4000 = vmatmul.mubr.f32.vlgmr.msra.gmra.mrb[2].mxu0 %v1301_v28  ;;  %v6577_v28 = vand.u32 4294901760, %v5548_v19  ;;  %v6583_v19 = vand.u32 4294901760, %v5702_v22  ;;  %v1926_v22 = vand.u32 4294901760, %v1874_v47 }
 0x30a   :  { %4734 = vmatpush3.bf16.msra.mxu0 %v4733_v11  ;;  %4034 = vmatprep.mubr.msk.f32.mxu0 %vm5182_vm0, %v5181_v0 }
 0x30b   :  { %4735 = vmatprep.subr.bf16.mxu0 %v5183_v33  ;;  %v4745_v52 = vpack.c.bf16 %v6578_v17, %v6577_v28  ;;  %v4754_v20 = vpack.c.bf16 %v6584_v37, %v6583_v19  ;;  %v5968_v2 = vpack.c.bf16 %v1929_v30, %v1926_v22  ;;  %v5985_v15 = vsub.f32 %v1874_v47, %v1926_v22 }
 0x30c   :  { %v2006_v17 = vsub.f32 %v5820_v21, %v6554_v24  ;;  %v2020_v19 = vsub.f32 %v5827_v16, %v6552_v59  ;;  %v2027_v37 = vsub.f32 %v5829_v41, %v6551_v61 }
 0x30e   :  { %4737 = vmatpush3.bf16.msra.mxu0 %v4736_v55  ;;  %v1998_v55 = vand.u32 4294901760, %v5818_v44  ;;  %v2007_v29 = vand.u32 4294901760, %v2006_v17 }
 0x30f   :  { %4738 = vmatprep.subr.bf16.mxu0 %v5183_v33 }
 0x312   :  { %4740 = vmatpush3.bf16.msra.mxu0 %v4739_v18  ;;  %v1999_v18 = vsub.f32 %v5818_v44, %v1998_v55 }
 0x313   :  { %4741 = vmatprep.subr.bf16.mxu0 %v5183_v33 }
 0x314   :  { %v2000_v28 = vand.u32 4294901760, %v1999_v18 }
 0x316   :  { %4743 = vmatpush3.bf16.msra.mxu0 %v4742_v39  ;;  %v1993_v39 = vand.u32 4294901760, %v1992_v32  ;;  %v6545_v32 = vand.u32 4294901760, %v5982_v34 }
 0x317   :  { %4744 = vmatprep.subr.bf16.mxu0 %v5183_v33 }
 0x318   :  { %v4808_v25 = vpack.c.bf16 %v2000_v28, %v1993_v39  ;;  %v2069_v28 = vsub.f32 %v5982_v34, %v6545_v32 }
 0x31a   :  { %4746 = vmatpush3.bf16.msra.mxu0 %v4745_v52  ;;  %v2013_v52 = vsub.f32 %v5823_v1, %v6553_v51 }
 0x31b   :  { %4747 = vmatprep.subr.bf16.mxu0 %v5183_v33 }
 0x31e   :  { %4749 = vmatpush3.bf16.msra.mxu0 %v4748_v26  ;;  %v2014_v26 = vand.u32 4294901760, %v2013_v52  ;;  %v2070_v52 = vand.u32 4294901760, %v2069_v28  ;;  %v4850_v28 = vpack.c.bf16 %v5987_v27, %v5985_v15 }
 0x31f   :  { %4750 = vmatprep.subr.bf16.mxu0 %v5183_v33 }
 0x322   :  { %4752 = vmatpush3.bf16.msra.mxu0 %v4751_v13  ;;  %v4811_v13 = vpack.c.bf16 %v2014_v26, %v2007_v29  ;;  %v6544_v29 = vand.u32 4294901760, %v5985_v15  ;;  %v6543_v26 = vand.u32 4294901760, %v5987_v27 }
 0x323   :  { %4753 = vmatprep.subr.bf16.mxu0 %v5183_v33 }
 0x326   :  { %4755 = vmatpush3.bf16.msra.mxu0 %v4754_v20  ;;  %v2021_v20 = vand.u32 4294901760, %v2020_v19 }
 0x327   :  { %4756 = vmatprep.subr.bf16.mxu0 %v5183_v33 }
 0x329   :  { %4035 = vmatmul.mubr.f32.vlgmr.msra.gmra.mrb[2].mxu0 %v5784_v53 }
 0x32a   :  { %4758 = vmatpush3.bf16.msra.mxu0 %v5522_v54  ;;  %4069 = vmatprep.mubr.msk.f32.mxu0 %vm5182_vm0, %v5181_v0  ;;  %v1871_v54 = vld [vmem:[#allocation4 + $0x58] sm:$0xff] }
 0x32b   :  { %4759 = vmatprep.subr.bf16.mxu0 %v5183_v33 }
 0x32e   :  { %4761 = vmatpush3.bf16.msra.mxu0 %v5530_v40  ;;  %v1870_v40 = vld [vmem:[#allocation4 + $0x50] sm:$0xff] }
 0x32f   :  { %4762 = vmatprep.subr.bf16.mxu0 %v5183_v33 }
 0x332   :  { %4764 = vmatpush3.bf16.msra.mxu0 %v5556_v57  ;;  %v1914_v57 = vand.u32 4294901760, %v1870_v40 }
 0x333   :  { %4765 = vmatprep.subr.bf16.mxu0 %v5183_v33 }
 0x334   :  { %v5976_v60 = vsub.f32 %v1870_v40, %v1914_v57  ;;  %v2028_v40 = vand.u32 4294901760, %v2027_v37  ;;  %v2076_v37 = vsub.f32 %v5985_v15, %v6544_v29 }
 0x336   :  { %4767 = vmatpush3.bf16.msra.mxu0 %v5564_v50  ;;  %v1917_v50 = vand.u32 4294901760, %v1871_v54  ;;  %v6548_v47 = vand.u32 4294901760, %v5976_v60 }
 0x337   :  { %4768 = vmatprep.subr.bf16.mxu0 %v5183_v33 }
 0x338   :  { %v5978_v3 = vsub.f32 %v1871_v54, %v1917_v50  ;;  %v6550_v54 = vand.u32 4294901760, %v5831_v9  ;;  %v2048_v30 = vsub.f32 %v5976_v60, %v6548_v47 }
 0x33a   :  { %4770 = vmatpush3.bf16.msra.mxu0 %v5572_v62  ;;  %v5958_v62 = vpack.c.bf16 %v1917_v50, %v1914_v57  ;;  %v6549_v57 = vand.u32 4294901760, %v5833_v42  ;;  %v4814_v50 = vpack.c.bf16 %v2028_v40, %v2021_v20  ;;  %v6547_v49 = vand.u32 4294901760, %v5978_v3 }
 0x33b   :  { %4771 = vmatprep.subr.bf16.mxu0 %v5183_v33  ;;  %v2049_v14 = vand.u32 4294901760, %v2048_v30  ;;  %v2083_v20 = vsub.f32 %v5987_v27, %v6543_v26  ;;  %v2077_v40 = vand.u32 4294901760, %v2076_v37  ;;  %v4835_v30 = vpack.c.bf16 %v5823_v1, %v5820_v21 }
 0x33c   :  { %4797 = vmatpush3.bf16.msra.mxu1 %v5958_v62  ;;  %v2041_v31 = vsub.f32 %v5833_v42, %v6549_v57 }
 0x33d   :  { %4798 = vmatprep.subr.bf16.mxu1 %v5183_v33 }
 0x33e   :  { %4773 = vmatpush3.bf16.msra.mxu0 %v5675_v48  ;;  %v1872_v48 = vld [vmem:[#allocation4 + $0x60] sm:$0xff] }
 0x33f   :  { %4774 = vmatprep.subr.bf16.mxu0 %v5183_v33 }
 0x342   :  { %4776 = vmatpush3.bf16.msra.mxu0 %v5679_v6  ;;  %v1920_v6 = vand.u32 4294901760, %v1872_v48 }
 0x343   :  { %4777 = vmatprep.subr.bf16.mxu0 %v5183_v33 }
 0x344   :  { %v5980_v23 = vsub.f32 %v1872_v48, %v1920_v6  ;;  %v2034_v48 = vsub.f32 %v5831_v9, %v6550_v54  ;;  %v2534_v54 = vld [vmem:[%s6514_s9 + $0x48] sm:$0xff] }
 0x346   :  { %4779 = vmatpush3.bf16.msra.mxu0 %v5685_v38  ;;  %v5962_v38 = vpack.c.bf16 %v1923_v46, %v1920_v6  ;;  %v2035_v6 = vand.u32 4294901760, %v2034_v48  ;;  %v2042_v46 = vand.u32 4294901760, %v2041_v31  ;;  %v2084_v48 = vand.u32 4294901760, %v2083_v20 }
 0x347   :  { %4924 = vmatprep.subr.bf16.mxu0 %v5183_v33 }
 0x348   :  { %4800 = vmatpush3.bf16.msra.mxu1 %v5962_v38  ;;  %v4817_v22 = vpack.c.bf16 %v2042_v46, %v2035_v6  ;;  %v4826_v31 = vpack.c.bf16 %v2084_v48, %v2077_v40  ;;  %v4829_v6 = vpack.c.bf16 %v5812_v7, %v5810_v58  ;;  %v4832_v46 = vpack.c.bf16 %v5818_v44, %v5814_v36 }
 0x349   :  { %4070 = vmatmul.mubr.f32.vlgmr.msra.gmra.mrb[2].mxu0 %v5784_v53  ;;  %v1977_v53 = vand.u32 4294901760, %v5810_v58  ;;  %4801 = vmatprep.subr.bf16.mxu1 %v5183_v33  ;;  %v6585_v7 = vand.u32 4294901760, %v5820_v21  ;;  %v6588_v36 = vand.u32 4294901760, %v5829_v41  ;;  %v6592_v21 = vand.u32 4294901760, %v5978_v3 }
 0x34a   :  { %4314 = vmatprep.mubr.msk.f32.mxu0 %vm5182_vm0, %v5181_v0 }
 0x34b   :  { %v1978_v4 = vsub.f32 %v5810_v58, %v1977_v53  ;;  %v6586_v58 = vand.u32 4294901760, %v5823_v1  ;;  %v6591_v1 = vand.u32 4294901760, %v5976_v60 }
 0x34c   :  { %4803 = vmatpush3.bf16.msra.mxu1 %v5968_v2 }
 0x34d   :  { %4804 = vmatprep.subr.bf16.mxu1 %v5183_v33  ;;  %v1979_v11 = vand.u32 4294901760, %v1978_v4  ;;  %v2055_v4 = vsub.f32 %v5978_v3, %v6547_v49 }
 0x34f   :  { %v5992_v56 = vpack.c.bf16 %v1986_v12, %v1979_v11  ;;  %v2056_v11 = vand.u32 4294901760, %v2055_v4  ;;  %v6546_v12 = vand.u32 4294901760, %v5980_v23  ;;  %v4838_v4 = vpack.c.bf16 %v5829_v41, %v5827_v16 }
 0x350   :  { %v6594_v41 = vand.u32 4294901760, %v5982_v34 }
 0x351   :  { %v4820_v18 = vpack.c.bf16 %v2056_v11, %v2049_v14  ;;  %v2062_v39 = vsub.f32 %v5980_v23, %v6546_v12  ;;  %v4841_v14 = vpack.c.bf16 %v5833_v42, %v5831_v9  ;;  %v4844_v11 = vpack.c.bf16 %v5978_v3, %v5976_v60 }
 0x353   :  { %v2063_v17 = vand.u32 4294901760, %v2062_v39  ;;  %v4847_v39 = vpack.c.bf16 %v5982_v34, %v5980_v23  ;;  %v2540_v34 = vld [vmem:[%s6514_s9 + $0x78] sm:$0xff] }
 0x355   :  { %v4823_v19 = vpack.c.bf16 %v2070_v52, %v2063_v17  ;;  %v3199_v17 = vld [vmem:[%s6511_s6] ss:$0 sm:$0xff] }
 0x41c   :  { %v1855_v52 = vpop.f32.mrb[2].mxu0 }
 0x41d   :  { %v5071_v37 = vadd.f32 %v3199_v17, %v1855_v52  ;;  %v4071_v20 = vpop.f32.mrb[3].mxu0  ;;  %v2531_v52 = vld [vmem:[%s6514_s9 + $0x30] sm:$0xff] }
 0x41e   :  { %v2533_v20 = vld [vmem:[%s6514_s9 + $0x40] sm:$0xff] }
 0x41f   :  { %v1859_v40 = vmax.f32 %v5071_v37, 0.0  ;;  %v2532_v37 = vld [vmem:[%s6514_s9 + $0x38] sm:$0xff] }
 0x421   :  { %v6067_v48 = vand.u32 4294901760, %v1859_v40 }
 0x423   :  { %v6070_v26 = vsub.f32 %v1859_v40, %v6067_v48 }
 0x425   :  { %v1966_v29 = vand.u32 4294901760, %v6070_v26 }
 0x427   :  { %v1967_v32 = vsub.f32 %v6070_v26, %v1966_v29 }
 0x429   :  { %v1968_v12 = vand.u32 4294901760, %v1967_v32 }
 0x42b   :  { %4105 = vmatmul.mubr.f32.vlgmr.msra.gmra.mrb[4].mxu1 %v1968_v12  ;;  %v2528_v12 = vld [vmem:[%s6514_s9 + $0x18] sm:$0xff] }
 0x42c   :  { %4806 = vmatpush3.bf16.msra.mxu1 %v5992_v56  ;;  %4139 = vmatprep.mubr.msk.f32.mxu1 %vm5182_vm0, %v5181_v0  ;;  %v2525_v56 = vld [vmem:[%s6514_s9] sm:$0xff] }
 0x42d   :  { %4807 = vmatprep.subr.bf16.mxu1 %v5183_v33 }
 0x430   :  { %4809 = vmatpush3.bf16.msra.mxu1 %v4808_v25  ;;  %v2526_v25 = vld [vmem:[%s6514_s9 + $0x8] sm:$0xff] }
 0x431   :  { %4810 = vmatprep.subr.bf16.mxu1 %v5183_v33 }
 0x434   :  { %4812 = vmatpush3.bf16.msra.mxu1 %v4811_v13  ;;  %v2527_v13 = vld [vmem:[%s6514_s9 + $0x10] sm:$0xff] }
 0x435   :  { %4813 = vmatprep.subr.bf16.mxu1 %v5183_v33  ;;  %v2555_v32 = vand.u32 4294901760, %v2527_v13 }
 0x437   :  { %v6124_v57 = vsub.f32 %v2527_v13, %v2555_v32  ;;  %v2576_v13 = vand.u32 4294901760, %v2534_v54 }
 0x438   :  { %4815 = vmatpush3.bf16.msra.mxu1 %v4814_v50  ;;  %v2549_v50 = vand.u32 4294901760, %v2525_v56 }
 0x439   :  { %4816 = vmatprep.subr.bf16.mxu1 %v5183_v33 }
 0x43a   :  { %v6120_v49 = vsub.f32 %v2525_v56, %v2549_v50  ;;  %v2567_v56 = vand.u32 4294901760, %v2531_v52 }
 0x43c   :  { %4818 = vmatpush3.bf16.msra.mxu1 %v4817_v22  ;;  %v2552_v22 = vand.u32 4294901760, %v2526_v25 }
 0x43d   :  { %4819 = vmatprep.subr.bf16.mxu1 %v5183_v33 }
 0x43e   :  { %v6118_v40 = vpack.c.bf16 %v2552_v22, %v2549_v50  ;;  %v6122_v47 = vsub.f32 %v2526_v25, %v2552_v22  ;;  %v2570_v25 = vand.u32 4294901760, %v2532_v37  ;;  %v2573_v50 = vand.u32 4294901760, %v2533_v20 }
 0x43f   :  { %v6140_v22 = vsub.f32 %v2531_v52, %v2567_v56 }
 0x440   :  { %4821 = vmatpush3.bf16.msra.mxu1 %v4820_v18  ;;  %v2529_v18 = vld [vmem:[%s6514_s9 + $0x20] sm:$0xff]  ;;  %4926 = vmatpush3.bf16.msra.mxu0 %v6118_v40 }
 0x441   :  { %4822 = vmatprep.subr.bf16.mxu1 %v5183_v33  ;;  %4927 = vmatprep.subr.bf16.mxu0 %v5183_v33 }
 0x444   :  { %4824 = vmatpush3.bf16.msra.mxu1 %v4823_v19  ;;  %v2530_v19 = vld [vmem:[%s6514_s9 + $0x28] sm:$0xff] }
 0x445   :  { %4825 = vmatprep.subr.bf16.mxu1 %v5183_v33  ;;  %v2564_v17 = vand.u32 4294901760, %v2530_v19 }
 0x447   :  { %v6136_v24 = vsub.f32 %v2530_v19, %v2564_v17 }
 0x448   :  { %4827 = vmatpush3.bf16.msra.mxu1 %v4826_v31  ;;  %v2558_v31 = vand.u32 4294901760, %v2528_v12 }
 0x449   :  { %4828 = vmatprep.subr.bf16.mxu1 %v5183_v33 }
 0x44a   :  { %v6129_v61 = vpack.c.bf16 %v2558_v31, %v2555_v32  ;;  %v6131_v59 = vsub.f32 %v2528_v12, %v2558_v31  ;;  %v6142_v32 = vsub.f32 %v2532_v37, %v2570_v25  ;;  %v6144_v12 = vsub.f32 %v2533_v20, %v2573_v50 }
 0x44b   :  { %4140 = vmatmul.mubr.f32.vlgmr.msra.gmra.mrb[4].mxu1 %v6067_v48 }
 0x44c   :  { %4830 = vmatpush3.bf16.msra.mxu1 %v4829_v6  ;;  %4174 = vmatprep.mubr.msk.f32.mxu1 %vm5182_vm0, %v5181_v0  ;;  %v2561_v6 = vand.u32 4294901760, %v2529_v18 }
 0x44d   :  { %4831 = vmatprep.subr.bf16.mxu1 %v5183_v33  ;;  %4929 = vmatpush3.bf16.msra.mxu0 %v6129_v61 }
 0x44e   :  { %v6133_v51 = vsub.f32 %v2529_v18, %v2561_v6  ;;  %v6146_v18 = vsub.f32 %v2534_v54, %v2576_v13  ;;  %4930 = vmatprep.subr.bf16.mxu0 %v5183_v33  ;;  %v6160_v54 = vpack.c.bf16 %v2570_v25, %v2567_v56 }
 0x450   :  { %4833 = vmatpush3.bf16.msra.mxu1 %v4832_v46  ;;  %v6152_v46 = vpack.c.bf16 %v2564_v17, %v2561_v6 }
 0x451   :  { %4834 = vmatprep.subr.bf16.mxu1 %v5183_v33 }
 0x452   :  { %4932 = vmatpush3.bf16.msra.mxu0 %v6152_v46 }
 0x453   :  { %4933 = vmatprep.subr.bf16.mxu0 %v5183_v33 }
 0x454   :  { %4836 = vmatpush3.bf16.msra.mxu1 %v4835_v30  ;;  %v6168_v30 = vpack.c.bf16 %v2576_v13, %v2573_v50 }
 0x455   :  { %4837 = vmatprep.subr.bf16.mxu1 %v5183_v33 }
 0x456   :  { %4935 = vmatpush3.bf16.msra.mxu0 %v6160_v54 }
 0x457   :  { %4936 = vmatprep.subr.bf16.mxu0 %v5183_v33 }
 0x458   :  { %4839 = vmatpush3.bf16.msra.mxu1 %v4838_v4  ;;  %v4877_v4 = vpack.c.bf16 %v1984_v63, %v1977_v53  ;;  %v4883_v53 = vpack.c.bf16 %v6586_v58, %v6585_v7  ;;  %v6587_v63 = vand.u32 4294901760, %v5827_v16  ;;  %v6593_v16 = vand.u32 4294901760, %v5980_v23  ;;  %v2539_v23 = vld [vmem:[%s6514_s9 + $0x70] sm:$0xff] }
 0x459   :  { %4840 = vmatprep.subr.bf16.mxu1 %v5183_v33 }
 0x45a   :  { %4938 = vmatpush3.bf16.msra.mxu0 %v6168_v30  ;;  %v4886_v44 = vpack.c.bf16 %v6588_v36, %v6587_v63  ;;  %v2670_v63 = vand.u32 4294901760, %v6133_v51  ;;  %v2677_v36 = vand.u32 4294901760, %v6136_v24 }
 0x45b   :  { %4939 = vmatprep.subr.bf16.mxu0 %v5183_v33 }
 0x45c   :  { %4842 = vmatpush3.bf16.msra.mxu1 %v4841_v14  ;;  %v4880_v14 = vpack.c.bf16 %v1998_v55, %v1991_v43  ;;  %v6589_v43 = vand.u32 4294901760, %v5831_v9  ;;  %v6590_v55 = vand.u32 4294901760, %v5833_v42  ;;  %v6595_v9 = vand.u32 4294901760, %v5985_v15 }
 0x45d   :  { %4843 = vmatprep.subr.bf16.mxu1 %v5183_v33  ;;  %v6596_v42 = vand.u32 4294901760, %v5987_v27  ;;  %v2591_v15 = vand.u32 4294901760, %v2539_v23  ;;  %v2594_v27 = vand.u32 4294901760, %v2540_v34 }
 0x45f   :  { %v6296_v19 = vpack.c.bf16 %v2594_v27, %v2591_v15  ;;  %v6313_v56 = vsub.f32 %v2539_v23, %v2591_v15  ;;  %v6315_v25 = vsub.f32 %v2540_v34, %v2594_v27 }
 0x460   :  { %4845 = vmatpush3.bf16.msra.mxu1 %v4844_v11  ;;  %v4895_v11 = vpack.c.bf16 %v6594_v41, %v6593_v16  ;;  %v2684_v16 = vand.u32 4294901760, %v6140_v22  ;;  %v2691_v41 = vand.u32 4294901760, %v6142_v32 }
 0x461   :  { %4846 = vmatprep.subr.bf16.mxu1 %v5183_v33 }
 0x464   :  { %4848 = vmatpush3.bf16.msra.mxu1 %v4847_v39  ;;  %v4898_v39 = vpack.c.bf16 %v6596_v42, %v6595_v9  ;;  %v2685_v9 = vsub.f32 %v6140_v22, %v2684_v16  ;;  %v2692_v42 = vsub.f32 %v6142_v32, %v2691_v41 }
 0x465   :  { %4849 = vmatprep.subr.bf16.mxu1 %v5183_v33 }
 0x468   :  { %4851 = vmatpush3.bf16.msra.mxu1 %v4850_v28  ;;  %v2642_v28 = vand.u32 4294901760, %v6120_v49 }
 0x469   :  { %4852 = vmatprep.subr.bf16.mxu1 %v5183_v33 }
 0x46a   :  { %v2643_v31 = vsub.f32 %v6120_v49, %v2642_v28 }
 0x46b   :  { %4175 = vmatmul.mubr.f32.vlgmr.msra.gmra.mrb[4].mxu1 %v6070_v26  ;;  %v4892_v26 = vpack.c.bf16 %v6592_v21, %v6591_v1 }
 0x46c   :  { %4854 = vmatpush3.bf16.msra.mxu1 %v5808_v8  ;;  %4209 = vmatprep.mubr.msk.f32.mxu1 %vm5182_vm0, %v5181_v0  ;;  %v2644_v50 = vand.u32 4294901760, %v2643_v31 }
 0x46d   :  { %4855 = vmatprep.subr.bf16.mxu1 %v5183_v33 }
 0x470   :  { %4857 = vmatpush3.bf16.msra.mxu1 %v5816_v45 }
 0x471   :  { %4858 = vmatprep.subr.bf16.mxu1 %v5183_v33 }
 0x474   :  { %4860 = vmatpush3.bf16.msra.mxu1 %v5839_v5 }
 0x475   :  { %4861 = vmatprep.subr.bf16.mxu1 %v5183_v33 }
 0x478   :  { %4863 = vmatpush3.bf16.msra.mxu1 %v5847_v35 }
 0x479   :  { %4864 = vmatprep.subr.bf16.mxu1 %v5183_v33 }
 0x47c   :  { %4866 = vmatpush3.bf16.msra.mxu1 %v5855_v10 }
 0x47d   :  { %4867 = vmatprep.subr.bf16.mxu1 %v5183_v33 }
 0x480   :  { %4869 = vmatpush3.bf16.msra.mxu1 %v5958_v62 }
 0x481   :  { %4870 = vmatprep.subr.bf16.mxu1 %v5183_v33 }
 0x484   :  { %4872 = vmatpush3.bf16.msra.mxu1 %v5962_v38 }
 0x485   :  { %4873 = vmatprep.subr.bf16.mxu1 %v5183_v33 }
 0x488   :  { %4875 = vmatpush3.bf16.msra.mxu1 %v5968_v2 }
 0x489   :  { %4876 = vmatprep.subr.bf16.mxu1 %v5183_v33 }
 0x48b   :  { %4210 = vmatmul.mubr.f32.vlgmr.msra.gmra.mrb[4].mxu1 %v1966_v29  ;;  %v4889_v29 = vpack.c.bf16 %v6590_v55, %v6589_v43  ;;  %v2671_v55 = vsub.f32 %v6133_v51, %v2670_v63 }
 0x48c   :  { %4878 = vmatpush3.bf16.msra.mxu1 %v4877_v4  ;;  %4244 = vmatprep.mubr.msk.f32.mxu1 %vm5182_vm0, %v5181_v0  ;;  %v2656_v4 = vand.u32 4294901760, %v6124_v57 }
 0x48d   :  { %4879 = vmatprep.subr.bf16.mxu1 %v5183_v33  ;;  %v2672_v21 = vand.u32 4294901760, %v2671_v55 }
 0x48e   :  { %v2657_v58 = vsub.f32 %v6124_v57, %v2656_v4 }
 0x490   :  { %4881 = vmatpush3.bf16.msra.mxu1 %v4880_v14  ;;  %v2663_v14 = vand.u32 4294901760, %v6131_v59 }
 0x491   :  { %4882 = vmatprep.subr.bf16.mxu1 %v5183_v33 }
 0x494   :  { %4884 = vmatpush3.bf16.msra.mxu1 %v4883_v53  ;;  %v2664_v53 = vsub.f32 %v6131_v59, %v2663_v14 }
 0x495   :  { %4885 = vmatprep.subr.bf16.mxu1 %v5183_v33 }
 0x496   :  { %v2665_v43 = vand.u32 4294901760, %v2664_v53 }
 0x498   :  { %4887 = vmatpush3.bf16.msra.mxu1 %v4886_v44  ;;  %v2658_v44 = vand.u32 4294901760, %v2657_v58 }
 0x499   :  { %4888 = vmatprep.subr.bf16.mxu1 %v5183_v33 }
 0x49a   :  { %v4952_v1 = vpack.c.bf16 %v2665_v43, %v2658_v44 }
 0x49c   :  { %4890 = vmatpush3.bf16.msra.mxu1 %v4889_v29  ;;  %v2678_v29 = vsub.f32 %v6136_v24, %v2677_v36 }
 0x49d   :  { %4891 = vmatprep.subr.bf16.mxu1 %v5183_v33 }
 0x4a0   :  { %4893 = vmatpush3.bf16.msra.mxu1 %v4892_v26  ;;  %v2679_v26 = vand.u32 4294901760, %v2678_v29 }
 0x4a1   :  { %4894 = vmatprep.subr.bf16.mxu1 %v5183_v33 }
 0x4a4   :  { %4896 = vmatpush3.bf16.msra.mxu1 %v4895_v11  ;;  %v4955_v11 = vpack.c.bf16 %v2679_v26, %v2672_v21  ;;  %v6556_v21 = vand.u32 4294901760, %v6313_v56  ;;  %v6555_v26 = vand.u32 4294901760, %v6315_v25 }
 0x4a5   :  { %4897 = vmatprep.subr.bf16.mxu1 %v5183_v33 }
 0x4a8   :  { %4899 = vmatpush3.bf16.msra.mxu1 %v4898_v39  ;;  %v2686_v39 = vand.u32 4294901760, %v2685_v9 }
 0x4a9   :  { %4900 = vmatprep.subr.bf16.mxu1 %v5183_v33 }
 0x4ab   :  { %4245 = vmatmul.mubr.f32.vlgmr.msra.gmra.mrb[4].mxu1 %v6067_v48 }
 0x4ac   :  { %4902 = vmatpush3.bf16.msra.mxu1 %v5808_v8  ;;  %4279 = vmatprep.mubr.msk.f32.mxu1 %vm5182_vm0, %v5181_v0  ;;  %v2536_v8 = vld [vmem:[%s6514_s9 + $0x58] sm:$0xff] }
 0x4ad   :  { %4903 = vmatprep.subr.bf16.mxu1 %v5183_v33 }
 0x4b0   :  { %4905 = vmatpush3.bf16.msra.mxu1 %v5816_v45  ;;  %v2535_v45 = vld [vmem:[%s6514_s9 + $0x50] sm:$0xff] }
 0x4b1   :  { %4906 = vmatprep.subr.bf16.mxu1 %v5183_v33 }
 0x4b4   :  { %4908 = vmatpush3.bf16.msra.mxu1 %v5839_v5  ;;  %v2579_v5 = vand.u32 4294901760, %v2535_v45 }
 0x4b5   :  { %4909 = vmatprep.subr.bf16.mxu1 %v5183_v33 }
 0x4b6   :  { %v6304_v17 = vsub.f32 %v2535_v45, %v2579_v5  ;;  %v2693_v45 = vand.u32 4294901760, %v2692_v42  ;;  %v2741_v42 = vsub.f32 %v6313_v56, %v6556_v21 }
 0x4b8   :  { %4911 = vmatpush3.bf16.msra.mxu1 %v5847_v35  ;;  %v2582_v35 = vand.u32 4294901760, %v2536_v8  ;;  %v2712_v23 = vand.u32 4294901760, %v6304_v17 }
 0x4b9   :  { %4912 = vmatprep.subr.bf16.mxu1 %v5183_v33 }
 0x4ba   :  { %v6306_v52 = vsub.f32 %v2536_v8, %v2582_v35  ;;  %v2698_v8 = vand.u32 4294901760, %v6144_v12  ;;  %v2713_v27 = vsub.f32 %v6304_v17, %v2712_v23 }
 0x4bc   :  { %4914 = vmatpush3.bf16.msra.mxu1 %v5855_v10  ;;  %v6274_v10 = vpack.c.bf16 %v2582_v35, %v2579_v5  ;;  %v2705_v5 = vand.u32 4294901760, %v6146_v18  ;;  %v4958_v35 = vpack.c.bf16 %v2693_v45, %v2686_v39  ;;  %v2719_v34 = vand.u32 4294901760, %v6306_v52 }
 0x4bd   :  { %4915 = vmatprep.subr.bf16.mxu1 %v5183_v33  ;;  %v2748_v39 = vsub.f32 %v6315_v25, %v6555_v26  ;;  %v2742_v45 = vand.u32 4294901760, %v2741_v42 }
 0x4be   :  { %4941 = vmatpush3.bf16.msra.mxu0 %v6274_v10  ;;  %v2720_v31 = vsub.f32 %v6306_v52, %v2719_v34 }
 0x4bf   :  { %4942 = vmatprep.subr.bf16.mxu0 %v5183_v33 }
 0x4c0   :  { %4917 = vmatpush3.bf16.msra.mxu1 %v5958_v62  ;;  %v2537_v62 = vld [vmem:[%s6514_s9 + $0x60] sm:$0xff] }
 0x4c1   :  { %4918 = vmatprep.subr.bf16.mxu1 %v5183_v33 }
 0x4c4   :  { %4920 = vmatpush3.bf16.msra.mxu1 %v5962_v38  ;;  %v2538_v38 = vld [vmem:[%s6514_s9 + $0x68] sm:$0xff] }
 0x4c5   :  { %4921 = vmatprep.subr.bf16.mxu1 %v5183_v33  ;;  %v2588_v60 = vand.u32 4294901760, %v2538_v38 }
 0x4c7   :  { %v6310_v20 = vsub.f32 %v2538_v38, %v2588_v60  ;;  %v2706_v38 = vsub.f32 %v6146_v18, %v2705_v5 }
 0x4c8   :  { %4923 = vmatpush3.bf16.msra.mxu1 %v5968_v2  ;;  %v2585_v2 = vand.u32 4294901760, %v2537_v62 }
 0x4c9   :  { %v6557_v58 = vand.u32 4294901760, %v6310_v20 }
 0x4ca   :  { %v6284_v3 = vpack.c.bf16 %v2588_v60, %v2585_v2  ;;  %v6308_v37 = vsub.f32 %v2537_v62, %v2585_v2  ;;  %v2699_v62 = vsub.f32 %v6144_v12, %v2698_v8  ;;  %v2707_v60 = vand.u32 4294901760, %v2706_v38 }
 0x4cb   :  { %4280 = vmatmul.mubr.f32.vlgmr.msra.gmra.mrb[4].mxu1 %v6067_v48  ;;  %v2649_v48 = vand.u32 4294901760, %v6122_v47  ;;  %v2734_v43 = vsub.f32 %v6310_v20, %v6557_v58 }
 0x4cc   :  { %4944 = vmatpush3.bf16.msra.mxu0 %v6284_v3  ;;  %v2700_v2 = vand.u32 4294901760, %v2699_v62  ;;  %v2749_v62 = vand.u32 4294901760, %v2748_v39 }
 0x4cd   :  { %4945 = vmatprep.subr.bf16.mxu0 %v5183_v33  ;;  %v2650_v6 = vsub.f32 %v6122_v47, %v2649_v48  ;;  %v2735_v29 = vand.u32 4294901760, %v2734_v43  ;;  %v4994_v43 = vpack.c.bf16 %v6315_v25, %v6313_v56 }
 0x4ce   :  { %v4961_v15 = vpack.c.bf16 %v2707_v60, %v2700_v2  ;;  %v4970_v38 = vpack.c.bf16 %v2749_v62, %v2742_v45  ;;  %v4973_v2 = vpack.c.bf16 %v6122_v47, %v6120_v49  ;;  %v4976_v60 = vpack.c.bf16 %v6131_v59, %v6124_v57 }
 0x4cf   :  { %v2651_v13 = vand.u32 4294901760, %v2650_v6  ;;  %v2714_v6 = vand.u32 4294901760, %v2713_v27  ;;  %v4979_v27 = vpack.c.bf16 %v6136_v24, %v6133_v51  ;;  %v5027_v47 = vpack.c.bf16 %v2677_v36, %v2670_v63 }
 0x4d0   :  { %4947 = vmatpush3.bf16.msra.mxu0 %v6296_v19  ;;  %v5030_v59 = vpack.c.bf16 %v2691_v41, %v2684_v16  ;;  %v5033_v57 = vpack.c.bf16 %v2705_v5, %v2698_v8  ;;  %v5036_v24 = vpack.c.bf16 %v2719_v34, %v2712_v23  ;;  %v6597_v51 = vand.u32 4294901760, %v6308_v37 }
 0x4d1   :  { %4948 = vmatprep.subr.bf16.mxu0 %v5183_v33  ;;  %v6320_v7 = vpack.c.bf16 %v2651_v13, %v2644_v50  ;;  %v2721_v50 = vand.u32 4294901760, %v2720_v31  ;;  %v6558_v13 = vand.u32 4294901760, %v6308_v37  ;;  %v4982_v31 = vpack.c.bf16 %v6142_v32, %v6140_v22 }
 0x4d2   :  { %v6598_v49 = vand.u32 4294901760, %v6310_v20  ;;  %v6599_v32 = vand.u32 4294901760, %v6313_v56 }
 0x4d3   :  { %v4964_v53 = vpack.c.bf16 %v2721_v50, %v2714_v6  ;;  %v2727_v44 = vsub.f32 %v6308_v37, %v6558_v13  ;;  %v4985_v6 = vpack.c.bf16 %v6146_v18, %v6144_v12  ;;  %v4988_v50 = vpack.c.bf16 %v6306_v52, %v6304_v17 }
 0x4d4   :  { %v5039_v22 = vpack.c.bf16 %v6598_v49, %v6597_v51  ;;  %v6600_v12 = vand.u32 4294901760, %v6315_v25 }
 0x4d5   :  { %v2728_v55 = vand.u32 4294901760, %v2727_v44  ;;  %v4991_v44 = vpack.c.bf16 %v6310_v20, %v6308_v37 }
 0x4d6   :  { %v5042_v18 = vpack.c.bf16 %v6600_v12, %v6599_v32 }
 0x4d7   :  { %v4967_v9 = vpack.c.bf16 %v2735_v29, %v2728_v55  ;;  %v3200_v55 = vld [vmem:[%s6513_s8] ss:$0 sm:$0xff] }
 0x59e   :  { %v2520_v29 = vpop.f32.mrb[4].mxu1 }
 0x59f   :  { %v5072_v42 = vadd.f32 %v3200_v55, %v2520_v29  ;;  %v4281_v39 = vpop.f32.mrb[5].mxu1 }
 0x5a1   :  { %v2524_v45 = vmax.f32 %v5072_v42, 0.0 }
 0x5a3   :  { %v6395_v62 = vand.u32 4294901760, %v2524_v45 }
 0x5a5   :  { %v2630_v26 = vsub.f32 %v2524_v45, %v6395_v62 }
 0x5a7   :  { %v2631_v21 = vand.u32 4294901760, %v2630_v26 }
 0x5a9   :  { %v2632_v58 = vsub.f32 %v2630_v26, %v2631_v21 }
 0x5ab   :  { %v2633_v13 = vand.u32 4294901760, %v2632_v58 }
 0x5ad   :  { %4315 = vmatmul.mubr.f32.vlgmr.msra.gmra.mrb[4].mxu0 %v2633_v13 }
 0x5ae   :  { %4950 = vmatpush3.bf16.msra.mxu0 %v6320_v7  ;;  %4349 = vmatprep.mubr.msk.f32.mxu0 %vm5182_vm0, %v5181_v0  ;;  %v5021_v7 = vpack.c.bf16 %v2649_v48, %v2642_v28 }
 0x5af   :  { %4951 = vmatprep.subr.bf16.mxu0 %v5183_v33 }
 0x5b2   :  { %4953 = vmatpush3.bf16.msra.mxu0 %v4952_v1  ;;  %v5024_v1 = vpack.c.bf16 %v2663_v14, %v2656_v4 }
 0x5b3   :  { %4954 = vmatprep.subr.bf16.mxu0 %v5183_v33 }
 0x5b6   :  { %4956 = vmatpush3.bf16.msra.mxu0 %v4955_v11 }
 0x5b7   :  { %4957 = vmatprep.subr.bf16.mxu0 %v5183_v33 }
 0x5ba   :  { %4959 = vmatpush3.bf16.msra.mxu0 %v4958_v35 }
 0x5bb   :  { %4960 = vmatprep.subr.bf16.mxu0 %v5183_v33 }
 0x5be   :  { %4962 = vmatpush3.bf16.msra.mxu0 %v4961_v15 }
 0x5bf   :  { %4963 = vmatprep.subr.bf16.mxu0 %v5183_v33 }
 0x5c2   :  { %4965 = vmatpush3.bf16.msra.mxu0 %v4964_v53 }
 0x5c3   :  { %4966 = vmatprep.subr.bf16.mxu0 %v5183_v33 }
 0x5c6   :  { %4968 = vmatpush3.bf16.msra.mxu0 %v4967_v9 }
 0x5c7   :  { %4969 = vmatprep.subr.bf16.mxu0 %v5183_v33 }
 0x5ca   :  { %4971 = vmatpush3.bf16.msra.mxu0 %v4970_v38 }
 0x5cb   :  { %4972 = vmatprep.subr.bf16.mxu0 %v5183_v33 }
 0x5cd   :  { %4350 = vmatmul.mubr.f32.vlgmr.msra.gmra.mrb[4].mxu0 %v6395_v62 }
 0x5ce   :  { %4974 = vmatpush3.bf16.msra.mxu0 %v4973_v2  ;;  %4384 = vmatprep.mubr.msk.f32.mxu0 %vm5182_vm0, %v5181_v0 }
 0x5cf   :  { %4975 = vmatprep.subr.bf16.mxu0 %v5183_v33 }
 0x5d2   :  { %4977 = vmatpush3.bf16.msra.mxu0 %v4976_v60 }
 0x5d3   :  { %4978 = vmatprep.subr.bf16.mxu0 %v5183_v33 }
 0x5d6   :  { %4980 = vmatpush3.bf16.msra.mxu0 %v4979_v27 }
 0x5d7   :  { %4981 = vmatprep.subr.bf16.mxu0 %v5183_v33 }
 0x5da   :  { %4983 = vmatpush3.bf16.msra.mxu0 %v4982_v31 }
 0x5db   :  { %4984 = vmatprep.subr.bf16.mxu0 %v5183_v33 }
 0x5de   :  { %4986 = vmatpush3.bf16.msra.mxu0 %v4985_v6 }
 0x5df   :  { %4987 = vmatprep.subr.bf16.mxu0 %v5183_v33 }
 0x5e2   :  { %4989 = vmatpush3.bf16.msra.mxu0 %v4988_v50 }
 0x5e3   :  { %4990 = vmatprep.subr.bf16.mxu0 %v5183_v33 }
 0x5e6   :  { %4992 = vmatpush3.bf16.msra.mxu0 %v4991_v44 }
 0x5e7   :  { %4993 = vmatprep.subr.bf16.mxu0 %v5183_v33 }
 0x5ea   :  { %4995 = vmatpush3.bf16.msra.mxu0 %v4994_v43 }
 0x5eb   :  { %4996 = vmatprep.subr.bf16.mxu0 %v5183_v33 }
 0x5ed   :  { %4385 = vmatmul.mubr.f32.vlgmr.msra.gmra.mrb[4].mxu0 %v2630_v26 }
 0x5ee   :  { %4998 = vmatpush3.bf16.msra.mxu0 %v6118_v40  ;;  %4419 = vmatprep.mubr.msk.f32.mxu0 %vm5182_vm0, %v5181_v0 }
 0x5ef   :  { %4999 = vmatprep.subr.bf16.mxu0 %v5183_v33 }
 0x5f2   :  { %5001 = vmatpush3.bf16.msra.mxu0 %v6129_v61 }
 0x5f3   :  { %5002 = vmatprep.subr.bf16.mxu0 %v5183_v33 }
 0x5f6   :  { %5004 = vmatpush3.bf16.msra.mxu0 %v6152_v46 }
 0x5f7   :  { %5005 = vmatprep.subr.bf16.mxu0 %v5183_v33 }
 0x5fa   :  { %5007 = vmatpush3.bf16.msra.mxu0 %v6160_v54 }
 0x5fb   :  { %5008 = vmatprep.subr.bf16.mxu0 %v5183_v33 }
 0x5fe   :  { %5010 = vmatpush3.bf16.msra.mxu0 %v6168_v30 }
 0x5ff   :  { %5011 = vmatprep.subr.bf16.mxu0 %v5183_v33 }
 0x602   :  { %5013 = vmatpush3.bf16.msra.mxu0 %v6274_v10 }
 0x603   :  { %5014 = vmatprep.subr.bf16.mxu0 %v5183_v33 }
 0x606   :  { %5016 = vmatpush3.bf16.msra.mxu0 %v6284_v3 }
 0x607   :  { %5017 = vmatprep.subr.bf16.mxu0 %v5183_v33 }
 0x60a   :  { %5019 = vmatpush3.bf16.msra.mxu0 %v6296_v19 }
 0x60b   :  { %5020 = vmatprep.subr.bf16.mxu0 %v5183_v33 }
 0x60d   :  { %4420 = vmatmul.mubr.f32.vlgmr.msra.gmra.mrb[4].mxu0 %v2631_v21 }
 0x60e   :  { %5022 = vmatpush3.bf16.msra.mxu0 %v5021_v7  ;;  %4454 = vmatprep.mubr.msk.f32.mxu0 %vm5182_vm0, %v5181_v0 }
 0x60f   :  { %5023 = vmatprep.subr.bf16.mxu0 %v5183_v33 }
 0x612   :  { %5025 = vmatpush3.bf16.msra.mxu0 %v5024_v1 }
 0x613   :  { %5026 = vmatprep.subr.bf16.mxu0 %v5183_v33 }
 0x616   :  { %5028 = vmatpush3.bf16.msra.mxu0 %v5027_v47 }
 0x617   :  { %5029 = vmatprep.subr.bf16.mxu0 %v5183_v33 }
 0x61a   :  { %5031 = vmatpush3.bf16.msra.mxu0 %v5030_v59 }
 0x61b   :  { %5032 = vmatprep.subr.bf16.mxu0 %v5183_v33 }
 0x61e   :  { %5034 = vmatpush3.bf16.msra.mxu0 %v5033_v57 }
 0x61f   :  { %5035 = vmatprep.subr.bf16.mxu0 %v5183_v33 }
 0x622   :  { %5037 = vmatpush3.bf16.msra.mxu0 %v5036_v24 }
 0x623   :  { %5038 = vmatprep.subr.bf16.mxu0 %v5183_v33 }
 0x626   :  { %5040 = vmatpush3.bf16.msra.mxu0 %v5039_v22 }
 0x627   :  { %5041 = vmatprep.subr.bf16.mxu0 %v5183_v33 }
 0x62a   :  { %5043 = vmatpush3.bf16.msra.mxu0 %v5042_v18 }
 0x62b   :  { %5044 = vmatprep.subr.bf16.mxu0 %v5183_v33 }
 0x62d   :  { %4455 = vmatmul.mubr.f32.vlgmr.msra.gmra.mrb[4].mxu0 %v6395_v62 }
 0x62e   :  { %5046 = vmatpush3.bf16.msra.mxu0 %v6118_v40  ;;  %4489 = vmatprep.mubr.msk.f32.mxu0 %vm5182_vm0, %v5181_v0  ;;  %v3201_v0 = vld [vmem:[%s6515_s10] ss:$0 sm:$0xff] }
 0x62f   :  { %5047 = vmatprep.subr.bf16.mxu0 %v5183_v33 }
 0x632   :  { %5049 = vmatpush3.bf16.msra.mxu0 %v6129_v61 }
 0x633   :  { %5050 = vmatprep.subr.bf16.mxu0 %v5183_v33 }
 0x636   :  { %5052 = vmatpush3.bf16.msra.mxu0 %v6152_v46 }
 0x637   :  { %5053 = vmatprep.subr.bf16.mxu0 %v5183_v33 }
 0x63a   :  { %5055 = vmatpush3.bf16.msra.mxu0 %v6160_v54 }
 0x63b   :  { %5056 = vmatprep.subr.bf16.mxu0 %v5183_v33 }
 0x63e   :  { %5058 = vmatpush3.bf16.msra.mxu0 %v6168_v30 }
 0x63f   :  { %5059 = vmatprep.subr.bf16.mxu0 %v5183_v33 }
 0x642   :  { %5061 = vmatpush3.bf16.msra.mxu0 %v6274_v10 }
 0x643   :  { %5062 = vmatprep.subr.bf16.mxu0 %v5183_v33 }
 0x646   :  { %5064 = vmatpush3.bf16.msra.mxu0 %v6284_v3 }
 0x647   :  { %5065 = vmatprep.subr.bf16.mxu0 %v5183_v33 }
 0x64a   :  { %5067 = vmatpush3.bf16.msra.mxu0 %v6296_v19 }
 0x64d   :  { %4490 = vmatmul.mubr.f32.vlgmr.msra.gmra.mrb[4].mxu0 %v6395_v62 }
 0x720   :  { %v3185_v61 = vpop.f32.mrb[4].mxu0 }
 0x721   :  { %v5073_v40 = vadd.f32 %v3201_v0, %v3185_v61  ;;  %v4491_v46 = vpop.f32.mrb[5].mxu0 }
 0x723   :  { %3190 = vst.msk [vmem:[%s6516_s11] sm:$0xff] %vm3189_vm3, %v5073_v40 }
 0x724   :  { %3195 = vsyncpa [#allocation3], 1 }
 0x725   :  { %3196 = vsyncpa [#allocation5], 1 }

</bundles_post_ra>
